<compile_context>
chip_gen: v7x
topology: tpu7x:2x2x1
jax: 0.10.0
libtpu: 0.0.40
codegen_flags: <defaults>
</compile_context>

<pallas_src>
import functools
import math

import jax
import jax.numpy as jnp
from jax import lax
from jax.experimental import pallas as pl
from jax.experimental.pallas import tpu as pltpu

EPS = 1e-5  # nn.LayerNorm default


def _layer_norm(x, gamma, beta):
    mu = jnp.mean(x, axis=-1, keepdims=True)
    var = jnp.mean((x - mu) ** 2, axis=-1, keepdims=True)
    return (x - mu) * lax.rsqrt(var + EPS) * gamma + beta


# -----------------------------------------------------------------------------
# Kernel: one grid step = (one batch tile, one encoder layer).  The residual
# stream lives in a VMEM scratch across the layer axis; the MLP head runs at
# the last layer step and writes the (TB, 2) logits for this batch tile.
# -----------------------------------------------------------------------------
def _tab_transformer_kernel(
        x_ref, num_ref,
        wqkv_ref, bqkv_ref, wo_ref, bo_ref,
        g1_ref, be1_ref, w1_ref, b1_ref, w2_ref, b2_ref, g2_ref, be2_ref,
        hwn_ref, hwc_ref, hb1_ref, hw2_ref, hb2_ref,
        o_ref, x_state,
        *, n_heads, seq):
    layer = pl.program_id(1)
    n_layers = pl.num_programs(1)

    @pl.when(layer == 0)
    def _():                              # load this batch tile's embeddings
        x_state[...] = x_ref[...]

    x = x_state[...]                      # (TB*S, D) f32 residual stream
    M, D = x.shape
    tb = M // seq
    dh = D // n_heads
    scale = 1.0 / math.sqrt(dh)

    # ---- fused QKV projection (single matmul) ----
    qkv = jnp.dot(x, wqkv_ref[0], preferred_element_type=jnp.float32) + bqkv_ref[0]
    # scale folded into q (O(M*D)) instead of scaling the (S,S) score matrices
    q = (qkv[:, :D] * scale).reshape(tb, seq, D)
    k = qkv[:, D:2 * D].reshape(tb, seq, D)
    v = qkv[:, 2 * D:].reshape(tb, seq, D)

    # ---- per-sample multi-head attention (no cross-sample mask needed) ----
    wo = wo_ref[0]
    attn = jnp.zeros((M, D), jnp.float32)
    for h in range(n_heads):              # static unroll, n_heads is tiny
        lo, hi = h * dh, (h + 1) * dh
        s = jnp.einsum('bqd,bkd->bqk', q[:, :, lo:hi], k[:, :, lo:hi],
                       preferred_element_type=jnp.float32)       # (TB, S, S)
        s = s - jnp.max(s, axis=-1, keepdims=True)
        p = jnp.exp(s)
        p = p * pl.reciprocal(jnp.sum(p, axis=-1, keepdims=True), approx=True)
        ctx = jnp.einsum('bqk,bkd->bqd', p, v[:, :, lo:hi],
                         preferred_element_type=jnp.float32)     # (TB, S, dh)
        # accumulate per-head context straight through the output projection
        attn = attn + jnp.dot(ctx.reshape(M, dh), wo[lo:hi, :],
                              preferred_element_type=jnp.float32)
    attn = attn + bo_ref[0]

    # ---- residual + LayerNorm1 (post-norm, norm_first=False) ----
    y = _layer_norm(x + attn, g1_ref[0], be1_ref[0])

    # ---- FFN: Linear(D,F) -> ReLU -> Linear(F,D); bf16 weights, f32 acc ----
    h1 = jnp.maximum(
        jnp.dot(y.astype(jnp.bfloat16), w1_ref[0],
                preferred_element_type=jnp.float32) + b1_ref[0], 0.0)
    ff = jnp.dot(h1.astype(jnp.bfloat16), w2_ref[0],
                 preferred_element_type=jnp.float32) + b2_ref[0]

    # ---- residual + LayerNorm2 ----
    xn = _layer_norm(y + ff, g2_ref[0], be2_ref[0])
    x_state[...] = xn

    # ---- head: per-sample mean pool + Linear(num+D,64) -> ReLU -> Linear(64,2)
    @pl.when(layer == n_layers - 1)
    def _():
        cat_out = jnp.mean(xn.reshape(tb, seq, D), axis=1)       # (TB, D)
        numeric = num_ref[:, 0, :]                               # (TB, n_num)
        hh = jnp.maximum(
            jnp.dot(numeric, hwn_ref[...], preferred_element_type=jnp.float32)
            + jnp.dot(cat_out, hwc_ref[...], preferred_element_type=jnp.float32)
            + hb1_ref[...], 0.0)                                 # (TB, 64)
        o_ref[:, 0, :] = jnp.dot(hh, hw2_ref[...],
                                 preferred_element_type=jnp.float32) + hb2_ref[...]


# -----------------------------------------------------------------------------
# Wrapper: embedding gather (glue), then one pallas_call over
# grid = (batch_tiles, n_layers).
# -----------------------------------------------------------------------------
def tab_transformer_forward(params, numeric, categorical, *, n_heads,
                            batch_tile=None):
    emb = params["embed_tables"]
    cat_embeds = jnp.stack(
        [emb[i][categorical[:, i]] for i in range(len(emb))], axis=1
    ).astype(jnp.float32)                                  # (B, S, D)
    B, S, D = cat_embeds.shape
    x_flat = cat_embeds.reshape(B * S, D)
    numeric3 = numeric.astype(jnp.float32).reshape(B, 1, -1)
    n_num = numeric3.shape[-1]
    L = params["wqkv"].shape[0]
    F = params["w1"].shape[-1]

    tb = batch_tile or B
    assert B % tb == 0, "batch must be divisible by batch_tile"
    n_tiles = B // tb
    grid = (n_tiles, L)

    wmap = lambda b, l: (l, 0, 0)          # per-layer weights (pipelined over l)
    hmap = lambda b, l: (0, 0)             # small head weights, fully resident

    in_specs = [
        pl.BlockSpec((tb * S, D), lambda b, l: (b, 0)),          # x_flat
        pl.BlockSpec((tb, 1, n_num), lambda b, l: (b, 0, 0)),    # numeric
        pl.BlockSpec((1, D, 3 * D), wmap),                       # wqkv
        pl.BlockSpec((1, 1, 3 * D), wmap),                       # bqkv
        pl.BlockSpec((1, D, D), wmap),                           # wo
        pl.BlockSpec((1, 1, D), wmap),                           # bo
        pl.BlockSpec((1, 1, D), wmap),                           # g1
        pl.BlockSpec((1, 1, D), wmap),                           # be1
        pl.BlockSpec((1, D, F), wmap),                           # w1 (bf16)
        pl.BlockSpec((1, 1, F), wmap),                           # b1
        pl.BlockSpec((1, F, D), wmap),                           # w2 (bf16, (F,D))
        pl.BlockSpec((1, 1, D), wmap),                           # b2
        pl.BlockSpec((1, 1, D), wmap),                           # g2
        pl.BlockSpec((1, 1, D), wmap),                           # be2
        pl.BlockSpec((n_num, 64), hmap),                         # fc_w_num
        pl.BlockSpec((D, 64), hmap),                             # fc_w_cat
        pl.BlockSpec((1, 64), hmap),                             # fc_b1
        pl.BlockSpec((64, 2), hmap),                             # fc_w2
        pl.BlockSpec((1, 2), hmap),                              # fc_b2
    ]
    out_spec = pl.BlockSpec((tb, 1, 2), lambda b, l: (b, 0, 0))

    # Rough advisory cost estimate (per review): FFN matmuls dominate.
    flops_per_step = (2 * tb * S * D * 3 * D            # QKV
                      + 4 * tb * S * S * D              # scores + p@v (all heads)
                      + 2 * tb * S * D * D              # out-proj
                      + 4 * tb * S * D * F)             # FFN up + down
    bytes_per_step = (2 * D * F * 2                     # w1 + w2 (bf16)
                      + 2 * tb * S * D * 4)             # residual stream in/out
    cost = pl.CostEstimate(
        flops=int(flops_per_step * n_tiles * L),
        transcendentals=int(n_heads * tb * S * S * n_tiles * L),
        bytes_accessed=int(bytes_per_step * n_tiles * L))

    out3 = pl.pallas_call(
        functools.partial(_tab_transformer_kernel, n_heads=n_heads, seq=S),
        out_shape=jax.ShapeDtypeStruct((B, 1, 2), jnp.float32),
        grid_spec=pltpu.PrefetchScalarGridSpec(
            num_scalar_prefetch=0,
            grid=grid,
            in_specs=in_specs,
            out_specs=out_spec,
            scratch_shapes=[pltpu.VMEM((tb * S, D), jnp.float32)]),
        compiler_params=pltpu.CompilerParams(
            dimension_semantics=("parallel", "arbitrary"),
            vmem_limit_bytes=32 * 1024 * 1024),
        cost_estimate=cost,
    )(x_flat, numeric3,
      params["wqkv"], params["bqkv"], params["wo"], params["bo"],
      params["g1"], params["be1"], params["w1"], params["b1"],
      params["w2"], params["b2"], params["g2"], params["be2"],
      params["fc_w_num"], params["fc_w_cat"], params["fc_b1"],
      params["fc_w2"], params["fc_b2"])
    return out3.reshape(B, 2)


# -----------------------------------------------------------------------------
# Deterministic synthetic parameters.  Linear weights stored so the kernel
# computes x @ W; FFN weights in bf16 (the dominant HBM traffic), everything
# touching LayerNorm / softmax statistics and biases kept f32.
# -----------------------------------------------------------------------------
def init_params(key, num_numeric, cat_dims, embed_dim, n_layers, ffn_dim):
    D = embed_dim
    kit = iter(jax.random.split(key, 32))

    def rnd(shape, scale=0.1, dtype=jnp.float32):
        return (scale * jax.random.normal(next(kit), shape, jnp.float32)).astype(dtype)

    bf16 = jnp.bfloat16
    return {
        "embed_tables": [rnd((d, D), 1.0) for d in cat_dims],
        "wqkv": rnd((n_layers, D, 3 * D)),
        "bqkv": rnd((n_layers, 1, 3 * D), 0.05),
        "wo": rnd((n_layers, D, D)),
        "bo": rnd((n_layers, 1, D), 0.05),
        "g1": 1.0 + rnd((n_layers, 1, D), 0.05),
        "be1": rnd((n_layers, 1, D), 0.05),
        "w1": rnd((n_layers, D, ffn_dim), dtype=bf16),
        "b1": rnd((n_layers, 1, ffn_dim), 0.05),
        "w2": rnd((n_layers, ffn_dim, D), dtype=bf16),   # (in=F, out=D): no transpose
        "b2": rnd((n_layers, 1, D), 0.05),
        "g2": 1.0 + rnd((n_layers, 1, D), 0.05),
        "be2": rnd((n_layers, 1, D), 0.05),
        # head Linear(num_numeric + D, 64) split into numeric / categorical parts
        "fc_w_num": rnd((num_numeric, 64)),
        "fc_w_cat": rnd((D, 64)),
        "fc_b1": rnd((1, 64), 0.05),
        "fc_w2": rnd((64, 2)),
        "fc_b2": rnd((1, 2), 0.05),
    }


# Pure-JAX reference (same math / dtypes as the PyTorch module in eval mode).
def reference_forward(params, numeric, categorical, *, n_heads):
    f = lambda a: a.astype(jnp.float32)
    emb = params["embed_tables"]
    x = jnp.stack([emb[i][categorical[:, i]] for i in range(len(emb))],
                  axis=1).astype(jnp.float32)              # (B, S, D)
    B, S, D = x.shape
    dh = D // n_heads
    L = params["wqkv"].shape[0]

    def ln(v, g, b):
        mu = jnp.mean(v, -1, keepdims=True)
        var = jnp.mean((v - mu) ** 2, -1, keepdims=True)
        return (v - mu) / jnp.sqrt(var + EPS) * g + b

    for l in range(L):
        qkv = x @ f(params["wqkv"][l]) + f(params["bqkv"][l])
        q = qkv[..., :D].reshape(B, S, n_heads, dh)
        k = qkv[..., D:2 * D].reshape(B, S, n_heads, dh)
        v = qkv[..., 2 * D:].reshape(B, S, n_heads, dh)
        s = jnp.einsum('bqhd,bkhd->bhqk', q, k) / math.sqrt(dh)
        p = jax.nn.softmax(s, axis=-1)
        ctx = jnp.einsum('bhqk,bkhd->bqhd', p, v).reshape(B, S, D)
        attn = ctx @ f(params["wo"][l]) + f(params["bo"][l])
        y = ln(x + attn, f(params["g1"][l]), f(params["be1"][l]))
        h1 = jax.nn.relu(y @ f(params["w1"][l]) + f(params["b1"][l]))
        ff = h1 @ f(params["w2"][l]) + f(params["b2"][l])
        x = ln(y + ff, f(params["g2"][l]), f(params["be2"][l]))
    cat_out = x.mean(axis=1)
    z = jnp.concatenate([numeric.astype(jnp.float32), cat_out], axis=-1)
    w_fc1 = jnp.concatenate([f(params["fc_w_num"]), f(params["fc_w_cat"])], axis=0)
    h = jax.nn.relu(z @ w_fc1 + params["fc_b1"])
    return h @ f(params["fc_w2"]) + params["fc_b2"]


if __name__ == "__main__":
    B = 8
    BATCH_TILE = 4                  # -> 2 batch tiles ("parallel" grid axis)
    NUM_NUMERIC = 6                 # ['age','balance','duration','campaign','pdays','previous']
    CAT_DIMS = [5, 7, 3, 4]         # synthetic categorical cardinalities (S = 4 tokens)
    EMBED_DIM = 8
    N_HEADS = 2
    N_LAYERS = 2
    FFN_DIM = 2048                  # nn.TransformerEncoderLayer default dim_feedforward

    key = jax.random.PRNGKey(0)
    kp, kn, kc = jax.random.split(key, 3)

    params = init_params(kp, NUM_NUMERIC, CAT_DIMS, EMBED_DIM, N_LAYERS, FFN_DIM)
    numeric = jax.random.normal(kn, (B, NUM_NUMERIC), jnp.float32)
    cat_keys = jax.random.split(kc, len(CAT_DIMS))
    categorical = jnp.stack(
        [jax.random.randint(cat_keys[i], (B,), 0, CAT_DIMS[i])
         for i in range(len(CAT_DIMS))],
        axis=1).astype(jnp.int32)   # (B, n_cat)

    out = tab_transformer_forward(params, numeric, categorical,
                                  n_heads=N_HEADS, batch_tile=BATCH_TILE)
    out = jax.block_until_ready(out)
    assert out.shape == (B, 2) and out.dtype == jnp.float32
    assert bool(jnp.all(jnp.isfinite(out)))

    ref = jax.block_until_ready(
        reference_forward(params, numeric, categorical, n_heads=N_HEADS))
    err = float(jnp.max(jnp.abs(out - ref)))
    assert err < 5e-2, f"parity vs pure-JAX reference failed: max|diff|={err}"
    print("KERNEL_OK")
</pallas_src>

<mosaic_0001>
module attributes {stable_mosaic.version = 11 : i64} {
  func.func @_tab_transformer_kernel(%arg0: i32, %arg1: i32, %arg2: memref<16x8xf32, #tpu.memory_space<vmem>>, %arg3: memref<4x1x6xf32, #tpu.memory_space<vmem>>, %arg4: memref<1x8x24xf32, #tpu.memory_space<vmem>>, %arg5: memref<1x1x24xf32, #tpu.memory_space<vmem>>, %arg6: memref<1x8x8xf32, #tpu.memory_space<vmem>>, %arg7: memref<1x1x8xf32, #tpu.memory_space<vmem>>, %arg8: memref<1x1x8xf32, #tpu.memory_space<vmem>>, %arg9: memref<1x1x8xf32, #tpu.memory_space<vmem>>, %arg10: memref<1x8x2048xbf16, #tpu.memory_space<vmem>>, %arg11: memref<1x1x2048xf32, #tpu.memory_space<vmem>>, %arg12: memref<1x2048x8xbf16, #tpu.memory_space<vmem>>, %arg13: memref<1x1x8xf32, #tpu.memory_space<vmem>>, %arg14: memref<1x1x8xf32, #tpu.memory_space<vmem>>, %arg15: memref<1x1x8xf32, #tpu.memory_space<vmem>>, %arg16: memref<6x64xf32, #tpu.memory_space<vmem>>, %arg17: memref<8x64xf32, #tpu.memory_space<vmem>>, %arg18: memref<1x64xf32, #tpu.memory_space<vmem>>, %arg19: memref<64x2xf32, #tpu.memory_space<vmem>>, %arg20: memref<1x2xf32, #tpu.memory_space<vmem>>, %arg21: memref<4x1x2xf32, #tpu.memory_space<vmem>>, %arg22: memref<16x8xf32, #tpu.memory_space<vmem>>) attributes {dimension_semantics = [#tpu.dimension_semantics<parallel>, #tpu.dimension_semantics<arbitrary>], iteration_bounds = array<i64: 2, 2>, scalar_prefetch = 0 : i64, scratch_operands = 1 : i64, tpu.core_type = #tpu.core_type<tc>, window_params = [{transform_indices = @transform_0, window_bounds = array<i64: 16, 8>}, {transform_indices = @transform_1, window_bounds = array<i64: 4, 1, 6>}, {transform_indices = @transform_2, window_bounds = array<i64: 1, 8, 24>}, {transform_indices = @transform_3, window_bounds = array<i64: 1, 1, 24>}, {transform_indices = @transform_4, window_bounds = array<i64: 1, 8, 8>}, {transform_indices = @transform_5, window_bounds = array<i64: 1, 1, 8>}, {transform_indices = @transform_6, window_bounds = array<i64: 1, 1, 8>}, {transform_indices = @transform_7, window_bounds = array<i64: 1, 1, 8>}, {transform_indices = @transform_8, window_bounds = array<i64: 1, 8, 2048>}, {transform_indices = @transform_9, window_bounds = array<i64: 1, 1, 2048>}, {transform_indices = @transform_10, window_bounds = array<i64: 1, 2048, 8>}, {transform_indices = @transform_11, window_bounds = array<i64: 1, 1, 8>}, {transform_indices = @transform_12, window_bounds = array<i64: 1, 1, 8>}, {transform_indices = @transform_13, window_bounds = array<i64: 1, 1, 8>}, {pipeline_mode = #tpu.pipeline_mode<synchronous>, transform_indices = @transform_14, window_bounds = array<i64: 6, 64>}, {pipeline_mode = #tpu.pipeline_mode<synchronous>, transform_indices = @transform_15, window_bounds = array<i64: 8, 64>}, {pipeline_mode = #tpu.pipeline_mode<synchronous>, transform_indices = @transform_16, window_bounds = array<i64: 1, 64>}, {pipeline_mode = #tpu.pipeline_mode<synchronous>, transform_indices = @transform_17, window_bounds = array<i64: 64, 2>}, {pipeline_mode = #tpu.pipeline_mode<synchronous>, transform_indices = @transform_18, window_bounds = array<i64: 1, 2>}, {transform_indices = @transform_19, window_bounds = array<i64: 4, 1, 2>}]} {
    %c0_i32 = arith.constant 0 : i32
    %0 = arith.cmpi eq, %arg1, %c0_i32 : i32
    %1 = arith.extui %0 : i1 to i32
    %c0_i32_0 = arith.constant 0 : i32
    %2 = arith.cmpi ne, %1, %c0_i32_0 : i32
    scf.if %2 {
      %c0_66 = arith.constant 0 : index
      %c0_67 = arith.constant 0 : index
      %140 = vector.load %arg2[%c0_66, %c0_67] : memref<16x8xf32, #tpu.memory_space<vmem>>, vector<16x8xf32>
      %c0_68 = arith.constant 0 : index
      %c0_69 = arith.constant 0 : index
      %141 = vector.load %arg22[%c0_68, %c0_69] : memref<16x8xf32, #tpu.memory_space<vmem>>, vector<16x8xf32>
      tpu.vector_store %arg22[%c0_68, %c0_69], %140 {strides = array<i32>} : memref<16x8xf32, #tpu.memory_space<vmem>>, vector<16x8xf32>,
    } else {
    }
    %c0 = arith.constant 0 : index
    %c0_1 = arith.constant 0 : index
    %3 = vector.load %arg22[%c0, %c0_1] : memref<16x8xf32, #tpu.memory_space<vmem>>, vector<16x8xf32>
    %c0_2 = arith.constant 0 : index
    %c0_3 = arith.constant 0 : index
    %c0_4 = arith.constant 0 : index
    %4 = vector.load %arg4[%c0_2, %c0_3, %c0_4] : memref<1x8x24xf32, #tpu.memory_space<vmem>>, vector<1x8x24xf32>
    %5 = vector.shape_cast %4 : vector<1x8x24xf32> to vector<8x24xf32>
    %cst = arith.constant dense<0.000000e+00> : vector<16x24xf32>
    %6 = tpu.matmul %3, %5, %cst {dimension_numbers = #tpu.dot_dimension_numbers<[1], [0], [0], [1], [0, 0, 1, 1], [], []>} : vector<16x8xf32>, vector<8x24xf32>, vector<16x24xf32> -> vector<16x24xf32>
    %c0_5 = arith.constant 0 : index
    %c0_6 = arith.constant 0 : index
    %c0_7 = arith.constant 0 : index
    %7 = vector.load %arg5[%c0_5, %c0_6, %c0_7] : memref<1x1x24xf32, #tpu.memory_space<vmem>>, vector<1x1x24xf32>
    %8 = vector.shape_cast %7 : vector<1x1x24xf32> to vector<1x24xf32>
    %9 = vector.broadcast %8 : vector<1x24xf32> to vector<16x24xf32>
    %10 = arith.addf %6, %9 : vector<16x24xf32>
    %11 = vector.extract_strided_slice %10 {offsets = [0, 0], sizes = [16, 8], strides = [1, 1]} : vector<16x24xf32> to vector<16x8xf32>
    %cst_8 = arith.constant 5.000000e-01 : f32
    %12 = vector.broadcast %cst_8 : f32 to vector<16x8xf32>
    %13 = arith.mulf %11, %12 : vector<16x8xf32>
    %14 = vector.shape_cast %13 : vector<16x8xf32> to vector<4x4x8xf32>
    %15 = vector.extract_strided_slice %10 {offsets = [0, 8], sizes = [16, 8], strides = [1, 1]} : vector<16x24xf32> to vector<16x8xf32>
    %16 = vector.shape_cast %15 : vector<16x8xf32> to vector<4x4x8xf32>
    %17 = vector.extract_strided_slice %10 {offsets = [0, 16], sizes = [16, 8], strides = [1, 1]} : vector<16x24xf32> to vector<16x8xf32>
    %18 = vector.shape_cast %17 : vector<16x8xf32> to vector<4x4x8xf32>
    %c0_9 = arith.constant 0 : index
    %c0_10 = arith.constant 0 : index
    %c0_11 = arith.constant 0 : index
    %19 = vector.load %arg6[%c0_9, %c0_10, %c0_11] : memref<1x8x8xf32, #tpu.memory_space<vmem>>, vector<1x8x8xf32>
    %20 = vector.shape_cast %19 : vector<1x8x8xf32> to vector<8x8xf32>
    %cst_12 = arith.constant 0.000000e+00 : f32
    %21 = vector.broadcast %cst_12 : f32 to vector<16x8xf32>
    %22 = vector.extract_strided_slice %14 {offsets = [0, 0, 0], sizes = [4, 4, 4], strides = [1, 1, 1]} : vector<4x4x8xf32> to vector<4x4x4xf32>
    %23 = vector.extract_strided_slice %16 {offsets = [0, 0, 0], sizes = [4, 4, 4], strides = [1, 1, 1]} : vector<4x4x8xf32> to vector<4x4x4xf32>
    "tpu.trace_start"() <{level = 10 : i32, message = "bqd,bkd->bqk"}> : () -> ()
    %cst_13 = arith.constant dense<0.000000e+00> : vector<4x4x4xf32>
    %24 = tpu.matmul %22, %23, %cst_13 {dimension_numbers = #tpu.dot_dimension_numbers<[2], [2], [1], [1], [0, 0, 0, 1, 1, 1], [0], [0]>} : vector<4x4x4xf32>, vector<4x4x4xf32>, vector<4x4x4xf32> -> vector<4x4x4xf32>
    "tpu.trace_stop"() : () -> ()
    %cst_14 = arith.constant dense<0xFF800000> : vector<4x4xf32>
    %25 = vector.multi_reduction <maximumf>, %24, %cst_14 [2] : vector<4x4x4xf32> to vector<4x4xf32>
    %26 = vector.shape_cast %25 : vector<4x4xf32> to vector<4x4x1xf32>
    %27 = vector.broadcast %26 : vector<4x4x1xf32> to vector<4x4x4xf32>
    %28 = arith.subf %24, %27 : vector<4x4x4xf32>
    %29 = math.exp %28 : vector<4x4x4xf32>
    %cst_15 = arith.constant dense<0.000000e+00> : vector<4x4xf32>
    %30 = vector.multi_reduction <add>, %29, %cst_15 [2] : vector<4x4x4xf32> to vector<4x4xf32>
    %31 = vector.shape_cast %30 : vector<4x4xf32> to vector<4x4x1xf32>
    %32 = tpu.reciprocal %31 {approx = true} : vector<4x4x1xf32> -> vector<4x4x1xf32>
    %33 = vector.broadcast %32 : vector<4x4x1xf32> to vector<4x4x4xf32>
    %34 = arith.mulf %29, %33 : vector<4x4x4xf32>
    %35 = vector.extract_strided_slice %18 {offsets = [0, 0, 0], sizes = [4, 4, 4], strides = [1, 1, 1]} : vector<4x4x8xf32> to vector<4x4x4xf32>
    "tpu.trace_start"() <{level = 10 : i32, message = "bqk,bkd->bqd"}> : () -> ()
    %cst_16 = arith.constant dense<0.000000e+00> : vector<4x4x4xf32>
    %36 = tpu.matmul %34, %35, %cst_16 {dimension_numbers = #tpu.dot_dimension_numbers<[2], [1], [1], [2], [0, 0, 0, 1, 1, 2], [0], [0]>} : vector<4x4x4xf32>, vector<4x4x4xf32>, vector<4x4x4xf32> -> vector<4x4x4xf32>
    "tpu.trace_stop"() : () -> ()
    %37 = vector.shape_cast %36 : vector<4x4x4xf32> to vector<16x4xf32>
    %38 = vector.extract_strided_slice %20 {offsets = [0, 0], sizes = [4, 8], strides = [1, 1]} : vector<8x8xf32> to vector<4x8xf32>
    %cst_17 = arith.constant dense<0.000000e+00> : vector<16x8xf32>
    %39 = tpu.matmul %37, %38, %cst_17 {dimension_numbers = #tpu.dot_dimension_numbers<[1], [0], [0], [1], [0, 0, 1, 1], [], []>} : vector<16x4xf32>, vector<4x8xf32>, vector<16x8xf32> -> vector<16x8xf32>
    %40 = arith.addf %21, %39 : vector<16x8xf32>
    %41 = vector.extract_strided_slice %14 {offsets = [0, 0, 4], sizes = [4, 4, 4], strides = [1, 1, 1]} : vector<4x4x8xf32> to vector<4x4x4xf32>
    %42 = vector.extract_strided_slice %16 {offsets = [0, 0, 4], sizes = [4, 4, 4], strides = [1, 1, 1]} : vector<4x4x8xf32> to vector<4x4x4xf32>
    "tpu.trace_start"() <{level = 10 : i32, message = "bqd,bkd->bqk"}> : () -> ()
    %cst_18 = arith.constant dense<0.000000e+00> : vector<4x4x4xf32>
    %43 = tpu.matmul %41, %42, %cst_18 {dimension_numbers = #tpu.dot_dimension_numbers<[2], [2], [1], [1], [0, 0, 0, 1, 1, 1], [0], [0]>} : vector<4x4x4xf32>, vector<4x4x4xf32>, vector<4x4x4xf32> -> vector<4x4x4xf32>
    "tpu.trace_stop"() : () -> ()
    %cst_19 = arith.constant dense<0xFF800000> : vector<4x4xf32>
    %44 = vector.multi_reduction <maximumf>, %43, %cst_19 [2] : vector<4x4x4xf32> to vector<4x4xf32>
    %45 = vector.shape_cast %44 : vector<4x4xf32> to vector<4x4x1xf32>
    %46 = vector.broadcast %45 : vector<4x4x1xf32> to vector<4x4x4xf32>
    %47 = arith.subf %43, %46 : vector<4x4x4xf32>
    %48 = math.exp %47 : vector<4x4x4xf32>
    %cst_20 = arith.constant dense<0.000000e+00> : vector<4x4xf32>
    %49 = vector.multi_reduction <add>, %48, %cst_20 [2] : vector<4x4x4xf32> to vector<4x4xf32>
    %50 = vector.shape_cast %49 : vector<4x4xf32> to vector<4x4x1xf32>
    %51 = tpu.reciprocal %50 {approx = true} : vector<4x4x1xf32> -> vector<4x4x1xf32>
    %52 = vector.broadcast %51 : vector<4x4x1xf32> to vector<4x4x4xf32>
    %53 = arith.mulf %48, %52 : vector<4x4x4xf32>
    %54 = vector.extract_strided_slice %18 {offsets = [0, 0, 4], sizes = [4, 4, 4], strides = [1, 1, 1]} : vector<4x4x8xf32> to vector<4x4x4xf32>
    "tpu.trace_start"() <{level = 10 : i32, message = "bqk,bkd->bqd"}> : () -> ()
    %cst_21 = arith.constant dense<0.000000e+00> : vector<4x4x4xf32>
    %55 = tpu.matmul %53, %54, %cst_21 {dimension_numbers = #tpu.dot_dimension_numbers<[2], [1], [1], [2], [0, 0, 0, 1, 1, 2], [0], [0]>} : vector<4x4x4xf32>, vector<4x4x4xf32>, vector<4x4x4xf32> -> vector<4x4x4xf32>
    "tpu.trace_stop"() : () -> ()
    %56 = vector.shape_cast %55 : vector<4x4x4xf32> to vector<16x4xf32>
    %57 = vector.extract_strided_slice %20 {offsets = [4, 0], sizes = [4, 8], strides = [1, 1]} : vector<8x8xf32> to vector<4x8xf32>
    %cst_22 = arith.constant dense<0.000000e+00> : vector<16x8xf32>
    %58 = tpu.matmul %56, %57, %cst_22 {dimension_numbers = #tpu.dot_dimension_numbers<[1], [0], [0], [1], [0, 0, 1, 1], [], []>} : vector<16x4xf32>, vector<4x8xf32>, vector<16x8xf32> -> vector<16x8xf32>
    %59 = arith.addf %40, %58 : vector<16x8xf32>
    %c0_23 = arith.constant 0 : index
    %c0_24 = arith.constant 0 : index
    %c0_25 = arith.constant 0 : index
    %60 = vector.load %arg7[%c0_23, %c0_24, %c0_25] : memref<1x1x8xf32, #tpu.memory_space<vmem>>, vector<1x1x8xf32>
    %61 = vector.shape_cast %60 : vector<1x1x8xf32> to vector<1x8xf32>
    %62 = vector.broadcast %61 : vector<1x8xf32> to vector<16x8xf32>
    %63 = arith.addf %59, %62 : vector<16x8xf32>
    %64 = arith.addf %3, %63 : vector<16x8xf32>
    %c0_26 = arith.constant 0 : index
    %c0_27 = arith.constant 0 : index
    %c0_28 = arith.constant 0 : index
    %65 = vector.load %arg8[%c0_26, %c0_27, %c0_28] : memref<1x1x8xf32, #tpu.memory_space<vmem>>, vector<1x1x8xf32>
    %66 = vector.shape_cast %65 : vector<1x1x8xf32> to vector<1x8xf32>
    %c0_29 = arith.constant 0 : index
    %c0_30 = arith.constant 0 : index
    %c0_31 = arith.constant 0 : index
    %67 = vector.load %arg9[%c0_29, %c0_30, %c0_31] : memref<1x1x8xf32, #tpu.memory_space<vmem>>, vector<1x1x8xf32>
    %68 = vector.shape_cast %67 : vector<1x1x8xf32> to vector<1x8xf32>
    %cst_32 = arith.constant dense<0.000000e+00> : vector<16xf32>
    %69 = vector.multi_reduction <add>, %64, %cst_32 [1] : vector<16x8xf32> to vector<16xf32>
    %70 = vector.shape_cast %69 : vector<16xf32> to vector<16x1xf32>
    %cst_33 = arith.constant 8.000000e+00 : f32
    %71 = vector.broadcast %cst_33 : f32 to vector<16x1xf32>
    %72 = arith.divf %70, %71 : vector<16x1xf32>
    %73 = vector.broadcast %72 : vector<16x1xf32> to vector<16x8xf32>
    %74 = arith.subf %64, %73 : vector<16x8xf32>
    %75 = arith.mulf %74, %74 : vector<16x8xf32>
    %cst_34 = arith.constant dense<0.000000e+00> : vector<16xf32>
    %76 = vector.multi_reduction <add>, %75, %cst_34 [1] : vector<16x8xf32> to vector<16xf32>
    %77 = vector.shape_cast %76 : vector<16xf32> to vector<16x1xf32>
    %cst_35 = arith.constant 8.000000e+00 : f32
    %78 = vector.broadcast %cst_35 : f32 to vector<16x1xf32>
    %79 = arith.divf %77, %78 : vector<16x1xf32>
    %80 = vector.broadcast %72 : vector<16x1xf32> to vector<16x8xf32>
    %81 = arith.subf %64, %80 : vector<16x8xf32>
    %cst_36 = arith.constant 9.99999974E-6 : f32
    %82 = vector.broadcast %cst_36 : f32 to vector<16x1xf32>
    %83 = arith.addf %79, %82 : vector<16x1xf32>
    %84 = math.rsqrt %83 : vector<16x1xf32>
    %85 = vector.broadcast %84 : vector<16x1xf32> to vector<16x8xf32>
    %86 = arith.mulf %81, %85 : vector<16x8xf32>
    %87 = vector.broadcast %66 : vector<1x8xf32> to vector<16x8xf32>
    %88 = arith.mulf %86, %87 : vector<16x8xf32>
    %89 = vector.broadcast %68 : vector<1x8xf32> to vector<16x8xf32>
    %90 = arith.addf %88, %89 : vector<16x8xf32>
    %91 = arith.truncf %90 : vector<16x8xf32> to vector<16x8xbf16>
    %c0_37 = arith.constant 0 : index
    %c0_38 = arith.constant 0 : index
    %c0_39 = arith.constant 0 : index
    %92 = vector.load %arg10[%c0_37, %c0_38, %c0_39] : memref<1x8x2048xbf16, #tpu.memory_space<vmem>>, vector<1x8x2048xbf16>
    %93 = vector.shape_cast %92 : vector<1x8x2048xbf16> to vector<8x2048xbf16>
    %cst_40 = arith.constant dense<0.000000e+00> : vector<16x2048xf32>
    %94 = tpu.matmul %91, %93, %cst_40 {dimension_numbers = #tpu.dot_dimension_numbers<[1], [0], [0], [1], [0, 0, 1, 1], [], []>} : vector<16x8xbf16>, vector<8x2048xbf16>, vector<16x2048xf32> -> vector<16x2048xf32>
    %c0_41 = arith.constant 0 : index
    %c0_42 = arith.constant 0 : index
    %c0_43 = arith.constant 0 : index
    %95 = vector.load %arg11[%c0_41, %c0_42, %c0_43] : memref<1x1x2048xf32, #tpu.memory_space<vmem>>, vector<1x1x2048xf32>
    %96 = vector.shape_cast %95 : vector<1x1x2048xf32> to vector<1x2048xf32>
    %97 = vector.broadcast %96 : vector<1x2048xf32> to vector<16x2048xf32>
    %98 = arith.addf %94, %97 : vector<16x2048xf32>
    %cst_44 = arith.constant 0.000000e+00 : f32
    %99 = vector.broadcast %cst_44 : f32 to vector<16x2048xf32>
    %100 = arith.maximumf %98, %99 : vector<16x2048xf32>
    %101 = arith.truncf %100 : vector<16x2048xf32> to vector<16x2048xbf16>
    %c0_45 = arith.constant 0 : index
    %c0_46 = arith.constant 0 : index
    %c0_47 = arith.constant 0 : index
    %102 = vector.load %arg12[%c0_45, %c0_46, %c0_47] : memref<1x2048x8xbf16, #tpu.memory_space<vmem>>, vector<1x2048x8xbf16>
    %103 = vector.shape_cast %102 : vector<1x2048x8xbf16> to vector<2048x8xbf16>
    %cst_48 = arith.constant dense<0.000000e+00> : vector<16x8xf32>
    %104 = tpu.matmul %101, %103, %cst_48 {dimension_numbers = #tpu.dot_dimension_numbers<[1], [0], [0], [1], [0, 0, 1, 1], [], []>} : vector<16x2048xbf16>, vector<2048x8xbf16>, vector<16x8xf32> -> vector<16x8xf32>
    %c0_49 = arith.constant 0 : index
    %c0_50 = arith.constant 0 : index
    %c0_51 = arith.constant 0 : index
    %105 = vector.load %arg13[%c0_49, %c0_50, %c0_51] : memref<1x1x8xf32, #tpu.memory_space<vmem>>, vector<1x1x8xf32>
    %106 = vector.shape_cast %105 : vector<1x1x8xf32> to vector<1x8xf32>
    %107 = vector.broadcast %106 : vector<1x8xf32> to vector<16x8xf32>
    %108 = arith.addf %104, %107 : vector<16x8xf32>
    %109 = arith.addf %90, %108 : vector<16x8xf32>
    %c0_52 = arith.constant 0 : index
    %c0_53 = arith.constant 0 : index
    %c0_54 = arith.constant 0 : index
    %110 = vector.load %arg14[%c0_52, %c0_53, %c0_54] : memref<1x1x8xf32, #tpu.memory_space<vmem>>, vector<1x1x8xf32>
    %111 = vector.shape_cast %110 : vector<1x1x8xf32> to vector<1x8xf32>
    %c0_55 = arith.constant 0 : index
    %c0_56 = arith.constant 0 : index
    %c0_57 = arith.constant 0 : index
    %112 = vector.load %arg15[%c0_55, %c0_56, %c0_57] : memref<1x1x8xf32, #tpu.memory_space<vmem>>, vector<1x1x8xf32>
    %113 = vector.shape_cast %112 : vector<1x1x8xf32> to vector<1x8xf32>
    %cst_58 = arith.constant dense<0.000000e+00> : vector<16xf32>
    %114 = vector.multi_reduction <add>, %109, %cst_58 [1] : vector<16x8xf32> to vector<16xf32>
    %115 = vector.shape_cast %114 : vector<16xf32> to vector<16x1xf32>
    %cst_59 = arith.constant 8.000000e+00 : f32
    %116 = vector.broadcast %cst_59 : f32 to vector<16x1xf32>
    %117 = arith.divf %115, %116 : vector<16x1xf32>
    %118 = vector.broadcast %117 : vector<16x1xf32> to vector<16x8xf32>
    %119 = arith.subf %109, %118 : vector<16x8xf32>
    %120 = arith.mulf %119, %119 : vector<16x8xf32>
    %cst_60 = arith.constant dense<0.000000e+00> : vector<16xf32>
    %121 = vector.multi_reduction <add>, %120, %cst_60 [1] : vector<16x8xf32> to vector<16xf32>
    %122 = vector.shape_cast %121 : vector<16xf32> to vector<16x1xf32>
    %cst_61 = arith.constant 8.000000e+00 : f32
    %123 = vector.broadcast %cst_61 : f32 to vector<16x1xf32>
    %124 = arith.divf %122, %123 : vector<16x1xf32>
    %125 = vector.broadcast %117 : vector<16x1xf32> to vector<16x8xf32>
    %126 = arith.subf %109, %125 : vector<16x8xf32>
    %cst_62 = arith.constant 9.99999974E-6 : f32
    %127 = vector.broadcast %cst_62 : f32 to vector<16x1xf32>
    %128 = arith.addf %124, %127 : vector<16x1xf32>
    %129 = math.rsqrt %128 : vector<16x1xf32>
    %130 = vector.broadcast %129 : vector<16x1xf32> to vector<16x8xf32>
    %131 = arith.mulf %126, %130 : vector<16x8xf32>
    %132 = vector.broadcast %111 : vector<1x8xf32> to vector<16x8xf32>
    %133 = arith.mulf %131, %132 : vector<16x8xf32>
    %134 = vector.broadcast %113 : vector<1x8xf32> to vector<16x8xf32>
    %135 = arith.addf %133, %134 : vector<16x8xf32>
    %c0_63 = arith.constant 0 : index
    %c0_64 = arith.constant 0 : index
    %136 = vector.load %arg22[%c0_63, %c0_64] : memref<16x8xf32, #tpu.memory_space<vmem>>, vector<16x8xf32>
    tpu.vector_store %arg22[%c0_63, %c0_64], %135 {strides = array<i32>} : memref<16x8xf32, #tpu.memory_space<vmem>>, vector<16x8xf32>,
    %c1_i32 = arith.constant 1 : i32
    %137 = arith.cmpi eq, %arg1, %c1_i32 : i32
    %138 = arith.extui %137 : i1 to i32
    %c0_i32_65 = arith.constant 0 : i32
    %139 = arith.cmpi ne, %138, %c0_i32_65 : i32
    scf.if %139 {
      %140 = vector.shape_cast %135 : vector<16x8xf32> to vector<4x4x8xf32>
      %cst_66 = arith.constant dense<0.000000e+00> : vector<4x8xf32>
      %141 = vector.multi_reduction <add>, %140, %cst_66 [1] : vector<4x4x8xf32> to vector<4x8xf32>
      %cst_67 = arith.constant 4.000000e+00 : f32
      %142 = vector.broadcast %cst_67 : f32 to vector<4x8xf32>
      %143 = arith.divf %141, %142 : vector<4x8xf32>
      %c0_68 = arith.constant 0 : index
      %c0_69 = arith.constant 0 : index
      %c0_70 = arith.constant 0 : index
      %144 = vector.load %arg3[%c0_68, %c0_69, %c0_70] : memref<4x1x6xf32, #tpu.memory_space<vmem>>, vector<4x1x6xf32>
      %145 = vector.shape_cast %144 : vector<4x1x6xf32> to vector<4x6xf32>
      %c0_71 = arith.constant 0 : index
      %c0_72 = arith.constant 0 : index
      %146 = vector.load %arg16[%c0_71, %c0_72] : memref<6x64xf32, #tpu.memory_space<vmem>>, vector<6x64xf32>
      %cst_73 = arith.constant dense<0.000000e+00> : vector<4x64xf32>
      %147 = tpu.matmul %145, %146, %cst_73 {dimension_numbers = #tpu.dot_dimension_numbers<[1], [0], [0], [1], [0, 0, 1, 1], [], []>} : vector<4x6xf32>, vector<6x64xf32>, vector<4x64xf32> -> vector<4x64xf32>
      %c0_74 = arith.constant 0 : index
      %c0_75 = arith.constant 0 : index
      %148 = vector.load %arg17[%c0_74, %c0_75] : memref<8x64xf32, #tpu.memory_space<vmem>>, vector<8x64xf32>
      %cst_76 = arith.constant dense<0.000000e+00> : vector<4x64xf32>
      %149 = tpu.matmul %143, %148, %cst_76 {dimension_numbers = #tpu.dot_dimension_numbers<[1], [0], [0], [1], [0, 0, 1, 1], [], []>} : vector<4x8xf32>, vector<8x64xf32>, vector<4x64xf32> -> vector<4x64xf32>
      %150 = arith.addf %147, %149 : vector<4x64xf32>
      %c0_77 = arith.constant 0 : index
      %c0_78 = arith.constant 0 : index
      %151 = vector.load %arg18[%c0_77, %c0_78] : memref<1x64xf32, #tpu.memory_space<vmem>>, vector<1x64xf32>
      %152 = vector.broadcast %151 : vector<1x64xf32> to vector<4x64xf32>
      %153 = arith.addf %150, %152 : vector<4x64xf32>
      %cst_79 = arith.constant 0.000000e+00 : f32
      %154 = vector.broadcast %cst_79 : f32 to vector<4x64xf32>
      %155 = arith.maximumf %153, %154 : vector<4x64xf32>
      %c0_80 = arith.constant 0 : index
      %c0_81 = arith.constant 0 : index
      %156 = vector.load %arg19[%c0_80, %c0_81] : memref<64x2xf32, #tpu.memory_space<vmem>>, vector<64x2xf32>
      %cst_82 = arith.constant dense<0.000000e+00> : vector<4x2xf32>
      %157 = tpu.matmul %155, %156, %cst_82 {dimension_numbers = #tpu.dot_dimension_numbers<[1], [0], [0], [1], [0, 0, 1, 1], [], []>} : vector<4x64xf32>, vector<64x2xf32>, vector<4x2xf32> -> vector<4x2xf32>
      %c0_83 = arith.constant 0 : index
      %c0_84 = arith.constant 0 : index
      %158 = vector.load %arg20[%c0_83, %c0_84] : memref<1x2xf32, #tpu.memory_space<vmem>>, vector<1x2xf32>
      %159 = vector.broadcast %158 : vector<1x2xf32> to vector<4x2xf32>
      %160 = arith.addf %157, %159 : vector<4x2xf32>
      %c0_85 = arith.constant 0 : index
      %c0_86 = arith.constant 0 : index
      %c0_87 = arith.constant 0 : index
      %161 = vector.load %arg21[%c0_85, %c0_86, %c0_87] : memref<4x1x2xf32, #tpu.memory_space<vmem>>, vector<4x1x2xf32>
      %162 = vector.shape_cast %161 : vector<4x1x2xf32> to vector<4x2xf32>
      %163 = vector.shape_cast %160 : vector<4x2xf32> to vector<4x1x2xf32>
      tpu.vector_store %arg21[%c0_85, %c0_86, %c0_87], %163 {strides = array<i32>} : memref<4x1x2xf32, #tpu.memory_space<vmem>>, vector<4x1x2xf32>,
    } else {
    }
    return
  }
  func.func @transform_0(%arg0: i32, %arg1: i32) -> (i32, i32) {
    %c0_i32 = arith.constant 0 : i32
    %c0_i32_0 = arith.constant 0 : i32
    return %arg0, %c0_i32 : i32, i32
  }
  func.func @transform_1(%arg0: i32, %arg1: i32) -> (i32, i32, i32) {
    %c0_i32 = arith.constant 0 : i32
    %c0_i32_0 = arith.constant 0 : i32
    %c0_i32_1 = arith.constant 0 : i32
    return %arg0, %c0_i32, %c0_i32_0 : i32, i32, i32
  }
  func.func @transform_2(%arg0: i32, %arg1: i32) -> (i32, i32, i32) {
    %c0_i32 = arith.constant 0 : i32
    %c0_i32_0 = arith.constant 0 : i32
    %c0_i32_1 = arith.constant 0 : i32
    return %arg1, %c0_i32, %c0_i32_0 : i32, i32, i32
  }
  func.func @transform_3(%arg0: i32, %arg1: i32) -> (i32, i32, i32) {
    %c0_i32 = arith.constant 0 : i32
    %c0_i32_0 = arith.constant 0 : i32
    %c0_i32_1 = arith.constant 0 : i32
    return %arg1, %c0_i32, %c0_i32_0 : i32, i32, i32
  }
  func.func @transform_4(%arg0: i32, %arg1: i32) -> (i32, i32, i32) {
    %c0_i32 = arith.constant 0 : i32
    %c0_i32_0 = arith.constant 0 : i32
    %c0_i32_1 = arith.constant 0 : i32
    return %arg1, %c0_i32, %c0_i32_0 : i32, i32, i32
  }
  func.func @transform_5(%arg0: i32, %arg1: i32) -> (i32, i32, i32) {
    %c0_i32 = arith.constant 0 : i32
    %c0_i32_0 = arith.constant 0 : i32
    %c0_i32_1 = arith.constant 0 : i32
    return %arg1, %c0_i32, %c0_i32_0 : i32, i32, i32
  }
  func.func @transform_6(%arg0: i32, %arg1: i32) -> (i32, i32, i32) {
    %c0_i32 = arith.constant 0 : i32
    %c0_i32_0 = arith.constant 0 : i32
    %c0_i32_1 = arith.constant 0 : i32
    return %arg1, %c0_i32, %c0_i32_0 : i32, i32, i32
  }
  func.func @transform_7(%arg0: i32, %arg1: i32) -> (i32, i32, i32) {
    %c0_i32 = arith.constant 0 : i32
    %c0_i32_0 = arith.constant 0 : i32
    %c0_i32_1 = arith.constant 0 : i32
    return %arg1, %c0_i32, %c0_i32_0 : i32, i32, i32
  }
  func.func @transform_8(%arg0: i32, %arg1: i32) -> (i32, i32, i32) {
    %c0_i32 = arith.constant 0 : i32
    %c0_i32_0 = arith.constant 0 : i32
    %c0_i32_1 = arith.constant 0 : i32
    return %arg1, %c0_i32, %c0_i32_0 : i32, i32, i32
  }
  func.func @transform_9(%arg0: i32, %arg1: i32) -> (i32, i32, i32) {
    %c0_i32 = arith.constant 0 : i32
    %c0_i32_0 = arith.constant 0 : i32
    %c0_i32_1 = arith.constant 0 : i32
    return %arg1, %c0_i32, %c0_i32_0 : i32, i32, i32
  }
  func.func @transform_10(%arg0: i32, %arg1: i32) -> (i32, i32, i32) {
    %c0_i32 = arith.constant 0 : i32
    %c0_i32_0 = arith.constant 0 : i32
    %c0_i32_1 = arith.constant 0 : i32
    return %arg1, %c0_i32, %c0_i32_0 : i32, i32, i32
  }
  func.func @transform_11(%arg0: i32, %arg1: i32) -> (i32, i32, i32) {
    %c0_i32 = arith.constant 0 : i32
    %c0_i32_0 = arith.constant 0 : i32
    %c0_i32_1 = arith.constant 0 : i32
    return %arg1, %c0_i32, %c0_i32_0 : i32, i32, i32
  }
  func.func @transform_12(%arg0: i32, %arg1: i32) -> (i32, i32, i32) {
    %c0_i32 = arith.constant 0 : i32
    %c0_i32_0 = arith.constant 0 : i32
    %c0_i32_1 = arith.constant 0 : i32
    return %arg1, %c0_i32, %c0_i32_0 : i32, i32, i32
  }
  func.func @transform_13(%arg0: i32, %arg1: i32) -> (i32, i32, i32) {
    %c0_i32 = arith.constant 0 : i32
    %c0_i32_0 = arith.constant 0 : i32
    %c0_i32_1 = arith.constant 0 : i32
    return %arg1, %c0_i32, %c0_i32_0 : i32, i32, i32
  }
  func.func @transform_14(%arg0: i32, %arg1: i32) -> (i32, i32) {
    %c0_i32 = arith.constant 0 : i32
    %c0_i32_0 = arith.constant 0 : i32
    %c0_i32_1 = arith.constant 0 : i32
    return %c0_i32, %c0_i32_0 : i32, i32
  }
  func.func @transform_15(%arg0: i32, %arg1: i32) -> (i32, i32) {
    %c0_i32 = arith.constant 0 : i32
    %c0_i32_0 = arith.constant 0 : i32
    %c0_i32_1 = arith.constant 0 : i32
    return %c0_i32, %c0_i32_0 : i32, i32
  }
  func.func @transform_16(%arg0: i32, %arg1: i32) -> (i32, i32) {
    %c0_i32 = arith.constant 0 : i32
    %c0_i32_0 = arith.constant 0 : i32
    %c0_i32_1 = arith.constant 0 : i32
    return %c0_i32, %c0_i32_0 : i32, i32
  }
  func.func @transform_17(%arg0: i32, %arg1: i32) -> (i32, i32) {
    %c0_i32 = arith.constant 0 : i32
    %c0_i32_0 = arith.constant 0 : i32
    %c0_i32_1 = arith.constant 0 : i32
    return %c0_i32, %c0_i32_0 : i32, i32
  }
  func.func @transform_18(%arg0: i32, %arg1: i32) -> (i32, i32) {
    %c0_i32 = arith.constant 0 : i32
    %c0_i32_0 = arith.constant 0 : i32
    %c0_i32_1 = arith.constant 0 : i32
    return %c0_i32, %c0_i32_0 : i32, i32
  }
  func.func @transform_19(%arg0: i32, %arg1: i32) -> (i32, i32, i32) {
    %c0_i32 = arith.constant 0 : i32
    %c0_i32_0 = arith.constant 0 : i32
    %c0_i32_1 = arith.constant 0 : i32
    return %arg0, %c0_i32, %c0_i32_0 : i32, i32, i32
  }
}

</mosaic_0001>

<bundles_post_ra>
// kernel: tpu_custom_call.1
= control target key start
LH: loop header
LB: loop body
LE: loop exit
PB: predicated region body
PF: predicated region fallthrough
CT: control target
= control target key end

     0   :  { %s6033_s30 = smov 0   ;;  %s6035_s20 = smov 0   ;;  %s6682_s0 = inlined_call_operand.vmem [shape: f32[32,8], index: 0, kind: input, shape index: {}]   ;;  %s6683_s1 = inlined_call_operand.vmem [shape: f32[8,1,6], index: 1, kind: input, shape index: {}]   ;;  %s6684_s2 = inlined_call_operand.vmem [shape: f32[2,8,24], index: 2, kind: input, shape index: {}]   ;;  %s6685_s3 = inlined_call_operand.vmem [shape: f32[2,1,24], index: 3, kind: input, shape index: {}]   ;;  %s6686_s4 = inlined_call_operand.vmem [shape: f32[2,8,8], index: 4, kind: input, shape index: {}]   ;;  %s6687_s5 = inlined_call_operand.vmem [shape: f32[2,1,8], index: 5, kind: input, shape index: {}]   ;;  %s6688_s6 = inlined_call_operand.vmem [shape: f32[2,1,8], index: 6, kind: input, shape index: {}]   ;;  %s6689_s7 = inlined_call_operand.vmem [shape: f32[2,1,8], index: 7, kind: input, shape index: {}]   ;;  %s6690_s8 = inlined_call_operand.vmem [shape: bf16[2,8,2048], index: 8, kind: input, shape index: {}]   ;;  %s6691_s9 = inlined_call_operand.vmem [shape: f32[2,1,2048], index: 9, kind: input, shape index: {}]   ;;  %s6692_s10 = inlined_call_operand.vmem [shape: bf16[2,2048,8], index: 10, kind: input, shape index: {}]   ;;  %s6693_s11 = inlined_call_operand.vmem [shape: f32[2,1,8], index: 11, kind: input, shape index: {}]   ;;  %s6694_s12 = inlined_call_operand.vmem [shape: f32[2,1,8], index: 12, kind: input, shape index: {}]   ;;  %s6695_s13 = inlined_call_operand.vmem [shape: f32[2,1,8], index: 13, kind: input, shape index: {}]   ;;  %s6696_s14 = inlined_call_operand.vmem [shape: f32[6,64], index: 14, kind: input, shape index: {}]   ;;  %s6697_s15 = inlined_call_operand.vmem [shape: f32[8,64], index: 15, kind: input, shape index: {}]   ;;  %s6698_s16 = inlined_call_operand.vmem [shape: f32[1,64], index: 16, kind: input, shape index: {}]   ;;  %s6699_s17 = inlined_call_operand.vmem [shape: f32[64,2], index: 17, kind: input, shape index: {}]   ;;  %s6700_s18 = inlined_call_operand.vmem [shape: f32[1,2], index: 18, kind: input, shape index: {}]   ;;  %s6701_s19 = inlined_call_operand.vmem [shape: f32[8,1,2], index: 19, kind: output, shape index: {}]  }
   0x1   :  { %6709 = sst [smem:[#allocation11_spill]] %s6682_s0  ;;  %s6031_s0 = smov 0  }
   0x2   :  { %6710 = sst [smem:[#allocation12_spill]] %s6683_s1  ;;  %s6037_s21 = smov 0  }
   0x3   :  { %6711 = sst [smem:[#allocation13_spill]] %s6684_s2  ;;  %s6039_s1 = smov 0  }
   0x4   :  { %6712 = sst [smem:[#allocation14_spill]] %s6685_s3 }
   0x5   :  { %6713 = sst [smem:[#allocation15_spill]] %s6696_s14 }
   0x6   :  { %6714 = sst [smem:[#allocation16_spill]] %s6697_s15 }
   0x7   :  { %6715 = sst [smem:[#allocation17_spill]] %s6698_s16 }
   0x8   :  { %6716 = sst [smem:[#allocation18_spill]] %s6699_s17 }
   0x9   :  { %6717 = sst [smem:[#allocation19_spill]] %s6700_s18 }
   0xa   :  { %6718 = sst [smem:[#allocation20_spill]] %s6701_s19 }
   0xb LB: > { %6719 = sst [smem:[#allocation3_spill]] %s5901_s0  ;;  %s38_s22 = sadd.s32 1, %s5909_s20  ;;  %s5917_s1 = sphi %s6039_s1, %s29_s1   ;;  %s5913_s21 = sphi %s6037_s21, %s6750_s21   ;;  %s5909_s20 = sphi %s6035_s20, %s6749_s20   ;;  %s5905_s30 = sphi %s6033_s30, %s6748_s30   ;;  %s5901_s0 = sphi %s6031_s0, %s6747_s0  }
   0xc   : > { %6720 = sst [smem:[#allocation4_spill]] %s5909_s20  ;;  %s41_s2 = sadd.s32 1, %s5913_s21 }
   0xd   : > { %6721 = sst [smem:[#allocation5_spill]] %s5913_s21  ;;  %p39_p0 = scmp.ge.s32.totalorder %s38_s22, 2 }
   0xe   : > { %6722 = sst [smem:[#allocation6_spill]] %s5917_s1  ;;  %p5042_p1 = scmp.ge.s32.totalorder %s5917_s1, 1 }
   0xf   : > { %p663_p2 = scmp.lt.s32.totalorder %s5917_s1, 5  ;;  %s6752_s22 = smov (%p39_p0, %s38_s22), 0 }
  0x10   : > { %6723 = sst [smem:[#allocation7_spill]] %s6752_s22  ;;  %s6754_s2 = smov (!%p39_p0, %s41_s2), %s5913_s21 }
  0x11   : > { %p664_p3 = pnand %p5042_p1, %p663_p2  ;;  %p43_p4 = scmp.ge.s32.totalorder %s6754_s2, 2 }
  0x13   : > { %s6756_s2 = smov (%p43_p4, %s6754_s2), 0  ;;  %667 = sbr.rel (%p664_p3) target bundleno = 3580 (0xdfc), region = 96 }
  0x14   : > { %6724 = sst [smem:[#allocation8_spill]] %s6756_s2 }
  0x1a   : > { %s5043_s23 = sshll.u32 %s5905_s30, 1  ;;  %s5045_s24 = sshll.u32 %s5905_s30, 2 }
  0x1b   : > { %p766_p5 = scmp.lt.s32.totalorder %s5043_s23, 3  ;;  %p772_p6 = scmp.lt.s32.totalorder %s5045_s24, 7 }
  0x1c   : > { %p776_p7 = scmp.lt.s32.totalorder %s5901_s0, 1  ;;  %s6725_s27 = sld [smem:[#allocation11_spill]] }
  0x1d   : > { %s6758_s23 = smov (!%p766_p5, %s5043_s23), 3  ;;  %s6760_s24 = smov (!%p772_p6, %s5045_s24), 7 }
  0x1e   : > { %s5044_s25 = sshll.u32 %s6758_s23, 3  ;;  %s6726_s21 = sld [smem:[#allocation12_spill]] }
  0x1f   : > { %s6073_s2 = scalar_select %p776_p7, %s5901_s0, 1 }
  0x20   : > { %s6728_s19 = sld [smem:[#allocation20_spill]]  ;;  %s6731_s1 = sld [smem:[#allocation13_spill]] }
  0x21   : > { %s5050_s16 = sshll.u32 %s6073_s2, 4  ;;  %s812_s23 = scalar_lea.vmem %s6693_s11, %s6073_s2 }
  0x22   : > { %s769_s28 = scalar_lea.vmem %s6725_s27, %s5044_s25  ;;  %s5271_s25 = sshll.u32 %s6073_s2, 6 }
  0x23   : > { %s6115_s17 = scalar_lea.vmem %s6691_s9, %s5050_s16  ;;  %s6732_s16 = sld [smem:[#allocation3_spill]] }
  0x24   : > { %s6070_s20 = scalar_lea.vmem %s6726_s21, %s6760_s24  ;;  %s5046_s21 = sshll.u32 %s6073_s2, 3 }
  0x25   : > { %6727 = sst [smem:[#allocation9_spill]] %s6070_s20  ;;  %s6091_s14 = scalar_lea.vmem %s6686_s4, %s5046_s21 }
  0x26   : > { %s6078_s30 = scalar_lea.vmem %s6728_s19, %s6760_s24  ;;  %s779_s27 = scalar_lea.vmem %s6731_s1, %s5046_s21 }
  0x27   : > { %6729 = sst [smem:[#allocation10_spill]] %s6078_s30  ;;  %s6109_s1 = scalar_lea.vmem %s6690_s8, %s5271_s25 }
  0x28   : > { %s5272_s20 = sshll.u32 %s6073_s2, 10  ;;  %s815_s25 = scalar_lea.vmem %s6694_s12, %s6073_s2 }
  0x29   : > { %s6121_s30 = scalar_lea.vmem %s6692_s10, %s5272_s20  ;;  %s818_s21 = scalar_lea.vmem %s6695_s13, %s6073_s2 }
  0x2a   : > { %p5054_p8 = scmp.ne.s32.totalorder %s6732_s16, 0 }
  0x2b   : > { %v829_v0 = vld [vmem:[%s769_s28] sm:$0xff] (!%p5054_p8)  ;;  %vm831_vm0 = vcmask (!%p5054_p8), 64512   ;;  %v830_v1 = vld [vmem:[%s769_s28 + $0x8] sm:$0xff] (!%p5054_p8) }
  0x2c   : > { %828 = sbr.rel (%p5054_p8) target bundleno = 51 (0x33), region = 100  ;;  %832 = vst.msk [vmem:[#allocation2] sm:$0xff] (!%p5054_p8), %vm831_vm0, %v829_v0  ;;  %833 = vst.msk [vmem:[#allocation2 + $0x8] sm:$0xff] (!%p5054_p8), %vm831_vm0, %v830_v1 }
  0x33 PF: > { %v836_v2 = vld [vmem:[%s779_s27] sm:$0xff]  ;;  %vm844_vm1 = vcmask 64512   ;;  %v835_v4 = vld [vmem:[#allocation2 + $0x8] sm:$0xff]  ;;  %v5919_v5 = vmov 0.0   ;;  %vm5920_vm2 = vmmov 0   ;;  %s6733_s3 = sld [smem:[#allocation14_spill]]  ;;  %s6735_s26 = scalar_lea.vmem %s6687_s5, %s6073_s2 }
  0x34   : > { %v834_v3 = vld [vmem:[#allocation2] sm:$0xff]  ;;  %5503 = vmatprep.subr.mxu0 %v836_v2  ;;  %5518 = vmatprep.subr.mxu1 %v5919_v5  ;;  %s5921_s24 = smov 120   ;;  %vm939_vm3 = vcmask 31744   ;;  %vm1242_vm4 = vcmask 27648   ;;  %s5922_s29 = smov 112   ;;  %vm1292_vm5 = vcmask 1043456  }
  0x35   : > { %5505 = vmatprep.mubr.msk.f32.mxu0 %vm844_vm1, %v834_v3  ;;  %5504 = vmatpush3.msra.mxu0 %v836_v2  ;;  %s5923_s20 = smov 116   ;;  %s5924_s19 = smov 124  }
  0x36   : > { %5506 = vmatmul.mubr.msk.f32.vlgmr.msra.gmra.mrb[0].mxu0 %vm844_vm1, %v835_v4  ;;  %5508 = vmatprep.subr.mxu0 %v5919_v5  ;;  %s5925_s0 = smov 108   ;;  %s6736_s15 = scalar_lea.vmem %s6688_s6, %s6073_s2 }
  0x37   : > { %5520 = vmatprep.mubr.msk.f32.mxu1 %vm5920_vm2, %v5919_v5  ;;  %5510 = vmatprep.mubr.msk.f32.mxu0 %vm5920_vm2, %v5919_v5 }
  0x39   : > { %s6734_s27 = scalar_lea.vmem %s6733_s3, %s6073_s2 }
  0x3a   : > { %v5055_v6 = vld [vmem:[%s6734_s27] ss:$0 sm:$0xff]  ;;  %s6737_s27 = scalar_lea.vmem %s6689_s7, %s6073_s2 }
 0x109   : > { %v5507_v7 = vpop.f32.mrb[0].mxu0 }
 0x10a   : > { %v6149_v8 = vadd.f32 %v5507_v7, %v5055_v6  ;;  %v917_v9 = vpop.f32.mrb[1].mxu0 }
 0x10b   : > { %v6151_v10 = vadd.f32 %v5055_v6, %v917_v9 }
 0x10c   : > { %1090 = vrot.lane.b32.xlu1 %v6149_v8, %s5921_s24  ;;  %v6157_v11 = vcombine.high %v6149_v8, %v6149_v8  ;;  %v6168_v15 = vmul.f32 0.5, %v6149_v8 }
 0x10d   : > { %937 = vrot.lane.b32.xlu0 %v6151_v10, %s5921_s24  ;;  %v6161_v12 = vcombine.high %v6151_v10, %v6151_v10  ;;  %v6173_v16 = vmul.f32 0.5, %v6151_v10 }
 0x10e   : > { %v931_v20 = vcombine.high %v6168_v15, %v6168_v15 }
 0x10f   : > { %v6186_v18 = vcombine.high %v6173_v16, %v6173_v16 }
 0x110   : > { %1166 = vrot.lane.b32.xlu1 %v6157_v11, %s5921_s24 }
 0x111   : > { %1014 = vrot.lane.b32.xlu0 %v6161_v12, %s5921_s24 }
 0x17e   : > { %v1091_v13 = vpop.permute.xlu1 %1090 }
 0x17f   : > { %5519 = vmatpush3.xpose.msk.msra.mxu1 %vm939_vm3, %v1091_v13  ;;  %v938_v14 = vpop.permute.xlu0 %937 }
 0x180   : > { %5509 = vmatpush3.xpose.msk.msra.mxu0 %vm939_vm3, %v938_v14  ;;  %5528 = vmatprep.subr.mxu1 %v5919_v5 }
 0x181   : > { %5513 = vmatprep.subr.mxu0 %v5919_v5 }
 0x182   : > { %5521 = vmatmul.mubr.msk.f32.vlgmr.msra.gmra.mrb[0].mxu1 %vm939_vm3, %v6168_v15  ;;  %v1167_v19 = vpop.permute.xlu1 %1166 }
 0x183   : > { %v1015_v17 = vpop.permute.xlu0 %1014  ;;  %5511 = vmatmul.mubr.msk.f32.vlgmr.msra.gmra.mrb[2].mxu0 %vm939_vm3, %v6173_v16  ;;  %5530 = vmatprep.mubr.msk.f32.mxu1 %vm5920_vm2, %v5919_v5 }
 0x184   : > { %5514 = vmatpush3.xpose.msk.msra.mxu0 %vm939_vm3, %v1015_v17  ;;  %5515 = vmatprep.mubr.msk.f32.mxu0 %vm5920_vm2, %v5919_v5 }
 0x185   : > { %5523 = vmatprep.subr.mxu0 %v5919_v5 }
 0x187   : > { %5516 = vmatmul.mubr.msk.f32.vlgmr.msra.gmra.mrb[4].mxu0 %vm939_vm3, %v6186_v18 }
 0x188   : > { %5524 = vmatpush3.xpose.msk.msra.mxu0 %vm939_vm3, %v1167_v19  ;;  %5525 = vmatprep.mubr.msk.f32.mxu0 %vm5920_vm2, %v5919_v5 }
 0x189   : > { %5533 = vmatprep.subr.mxu0 %v5919_v5 }
 0x18b   : > { %5526 = vmatmul.mubr.msk.f32.vlgmr.msra.gmra.mrb[6].mxu0 %vm939_vm3, %v931_v20 }
 0x18c   : > { %5535 = vmatprep.mubr.msk.f32.mxu0 %vm5920_vm2, %v5919_v5 }
 0x255   : > { %v1162_v21 = vpop.f32.mrb[0].mxu1 }
 0x256   : > { %v1010_v22 = vpop.f32.mrb[2].mxu0  ;;  %v5522_v23 = vpop.f32.mrb[1].mxu1  ;;  %v1249_v28 = vsel %vm1242_vm4, %v1162_v21, -inf }
 0x257   : > { %v5512_v24 = vpop.f32.mrb[3].mxu0  ;;  %v1243_v25 = vsel %vm1242_vm4, %v1010_v22, -inf }
 0x258   : > { %1244 = vmax.xlane.f32.xlu0 %v1243_v25 }
 0x25a   : > { %v1086_v26 = vpop.f32.mrb[4].mxu0 }
 0x25b   : > { %v5517_v27 = vpop.f32.mrb[5].mxu0  ;;  %v1246_v29 = vsel %vm1242_vm4, %v1086_v26, -inf }
 0x25c   : > { %1250 = vmax.xlane.f32.xlu0 %v1249_v28  ;;  %1247 = vmax.xlane.f32.xlu1 %v1246_v29 }
 0x25e   : > { %v1238_v30 = vpop.f32.mrb[6].mxu0 }
 0x25f   : > { %v5527_v31 = vpop.f32.mrb[7].mxu0  ;;  %v1252_v32 = vsel %vm1242_vm4, %v1238_v30, -inf }
 0x26d   : > { %1287 = vrot.lane.b32.xlu1 %v6151_v10, %s5922_s29 }
 0x271   : > { %1442 = vrot.lane.b32.xlu1 %v6149_v8, %s5922_s29 }
 0x272   : > { %1365 = vrot.lane.b32.xlu0 %v6161_v12, %s5922_s29 }
 0x275   : > { %1519 = vrot.lane.b32.xlu1 %v6157_v11, %s5922_s29 }
 0x279   : > { %1676 = vrot.lane.b32.xlu1 %v6161_v12, %s5923_s20 }
 0x291   : > { %1253 = vmax.xlane.f32.xlu0 %v1252_v32 }
 0x2a7   : > { %1598 = vrot.lane.b32.xlu0 %v6151_v10, %s5923_s20 }
 0x2e5   : > { %v1245_v33 = vpop.xlane.xlu0 %1244 }
 0x2e6   : > { %v1255_v34 = vsub.f32 %v1010_v22, %v1245_v33 }
 0x2e8   : > { %v1259_v39 = vmul.f32 1.442695, %v1255_v34 }
 0x2e9   : > { %v1251_v35 = vpop.xlane.xlu0 %1250  ;;  %v1248_v36 = vpop.xlane.xlu1 %1247 }
 0x2ea   : > { %v1257_v37 = vsub.f32 %v1162_v21, %v1251_v35  ;;  %v1256_v38 = vsub.f32 %v1086_v26, %v1248_v36 }
 0x2ec   : > { %v1263_v40 = vmul.f32 1.442695, %v1257_v37  ;;  %v1261_v41 = vmul.f32 1.442695, %v1256_v38 }
 0x2ed   : > { %v1366_v42 = vpop.permute.xlu0 %1365  ;;  %v1288_v43 = vpop.permute.xlu1 %1287 }
 0x2ee   : > { %5837 = vpow2.f32 %v1263_v40  ;;  %5529 = vmatpush3.msk.msra.mxu1 %vm1292_vm5, %v1288_v43  ;;  %5534 = vmatpush3.msk.msra.mxu0 %vm1292_vm5, %v1366_v42 }
 0x2ef   : > { %5839 = vpow2.f32 %v1261_v41  ;;  %5543 = vmatprep.subr.mxu0 %v5919_v5  ;;  %5538 = vmatprep.subr.mxu1 %v5919_v5 }
 0x2f0   : > { %5841 = vpow2.f32 %v1259_v39 }
 0x2f1   : > { %v1443_v55 = vpop.permute.xlu1 %1442 }
 0x2f5   : > { %v1520_v56 = vpop.permute.xlu1 %1519 }
 0x2f8   : > { %v5838_v44 = vpop.eup %5837 }
 0x2f9   : > { %v5840_v45 = vpop.eup %5839  ;;  %v1273_v46 = vsel %vm1242_vm4, %v5838_v44, 0.0  ;;  %v1677_v57 = vpop.permute.xlu1 %1676 }
 0x2fa   : > { %v5842_v47 = vpop.eup %5841  ;;  %1274 = vadd.xlane.f32.xlu1 %v1273_v46  ;;  %v1270_v48 = vsel %vm1242_vm4, %v5840_v45, 0.0 }
 0x2fb   : > { %1271 = vadd.xlane.f32.xlu0 %v1270_v48  ;;  %v1267_v49 = vsel %vm1242_vm4, %v5842_v47, 0.0 }
 0x2fe   : > { %1268 = vadd.xlane.f32.xlu1 %v1267_v49 }
 0x30f   : > { %1674 = vrot.lane.b32.xlu1 %v6186_v18, %s5924_s19 }
 0x311   : > { %1596 = vrot.lane.b32.xlu0 %v6173_v16, %s5924_s19 }
 0x313   : > { %1832 = vrot.lane.b32.xlu1 %v6157_v11, %s5923_s20 }
 0x317   : > { %1830 = vrot.lane.b32.xlu1 %v931_v20, %s5924_s19 }
 0x31e   : > { %v1254_v50 = vpop.xlane.xlu0 %1253 }
 0x31f   : > { %v1258_v51 = vsub.f32 %v1238_v30, %v1254_v50 }
 0x321   : > { %v1265_v52 = vmul.f32 1.442695, %v1258_v51 }
 0x322   : > { %v1599_v58 = vpop.permute.xlu0 %1598 }
 0x323   : > { %5843 = vpow2.f32 %v1265_v52 }
 0x32d   : > { %v5844_v53 = vpop.eup %5843 }
 0x32e   : > { %v1276_v54 = vsel %vm1242_vm4, %v5844_v53, 0.0 }
 0x330   : > { %1277 = vadd.xlane.f32.xlu0 %v1276_v54 }
 0x346   : > { %1754 = vrot.lane.b32.xlu0 %v6149_v8, %s5923_s20  ;;  %s6738_s20 = sld [smem:[#allocation3_spill]] }
 0x34a   : > { %1752 = vrot.lane.b32.xlu0 %v6168_v15, %s5924_s19 }
 0x34c   : > { %p5262_p9 = scmp.ne.s32.totalorder %s6738_s20, 1 }
 0x34d   : > { %s6740_s2 = sld [smem:[#allocation9_spill]] (!%p5262_p9)  ;;  %vm5928_vm6 = vmmov (!%p5262_p9), 0   ;;  %vm4485_vm7 = vcmask (!%p5262_p9), 60416   ;;  %s6741_s22 = sld [smem:[#allocation18_spill]] (!%p5262_p9)  ;;  %vm4529_vm8 = vcmask (!%p5262_p9), 1041409   ;;  %vm4531_vm9 = vcmask (!%p5262_p9), 1042434  }
 0x34e   : > { %vm4533_vm10 = vcmask (!%p5262_p9), 1043459   ;;  %s6742_s28 = sld [smem:[#allocation15_spill]] (!%p5262_p9)  ;;  %vm4638_vm11 = vcmask (!%p5262_p9), 1045504   ;;  %vm4635_vm12 = vcmask (!%p5262_p9), 48128   ;;  %vm4736_vm13 = vcmask (!%p5262_p9), 523264  }
 0x34f   : > { %vm4839_vm14 = vcmask (!%p5262_p9), 8192  }
 0x387   : > { %v1275_v59 = vpop.xlane.xlu1 %1274 }
 0x388   : > { %v1272_v60 = vpop.xlane.xlu0 %1271 }
 0x389   : > { %5845 = vrcp.f32 %v1272_v60 }
 0x38b   : > { %v1269_v61 = vpop.xlane.xlu1 %1268 }
 0x38c   : > { %5847 = vrcp.f32 %v1269_v61  ;;  %v1597_v4 = vpop.permute.xlu0 %1596 }
 0x38d   : > { %5849 = vrcp.f32 %v1275_v59 }
 0x38f   : > { %v1675_v13 = vpop.permute.xlu1 %1674 }
 0x393   : > { %v5846_v62 = vpop.eup %5845  ;;  %v1833_v16 = vpop.permute.xlu1 %1832 }
 0x394   : > { %v1284_v63 = vmul.f32 %v5846_v62, %v5840_v45 }
 0x396   : > { %v5848_v0 = vpop.eup %5847  ;;  %5536 = vmatmul.mubr.msk.f32.vlgmr.msra.gmra.mrb[8].mxu0 %vm939_vm3, %v1284_v63 }
 0x397   : > { %v1283_v1 = vmul.f32 %v5848_v0, %v5842_v47  ;;  %5544 = vmatpush3.msk.msra.mxu0 %vm1292_vm5, %v1520_v56  ;;  %5545 = vmatprep.mubr.msk.f32.mxu0 %vm5920_vm2, %v5919_v5  ;;  %v5850_v2 = vpop.eup %5849  ;;  %v1831_v17 = vpop.permute.xlu1 %1830 }
 0x398   : > { %5553 = vmatprep.subr.mxu0 %v5919_v5  ;;  %v1285_v3 = vmul.f32 %v5850_v2, %v5838_v44 }
 0x399   : > { %5531 = vmatmul.mubr.msk.f32.vlgmr.msra.gmra.mrb[2].mxu1 %vm939_vm3, %v1283_v1 }
 0x39a   : > { %5539 = vmatpush3.msk.msra.mxu1 %vm1292_vm5, %v1443_v55  ;;  %5540 = vmatprep.mubr.msk.f32.mxu1 %vm5920_vm2, %v5919_v5 }
 0x39b   : > { %5548 = vmatprep.subr.mxu1 %v5919_v5 }
 0x39d   : > { %5541 = vmatmul.mubr.msk.f32.vlgmr.msra.gmra.mrb[4].mxu1 %vm939_vm3, %v1285_v3 }
 0x39e   : > { %5550 = vmatprep.mubr.msk.f32.mxu1 %vm5920_vm2, %v5919_v5 }
 0x3a1   : > { %5549 = vmatpush3.xpose.msk.msra.mxu1 %vm939_vm3, %v1599_v58 }
 0x3a2   : > { %5558 = vmatprep.subr.mxu1 %v5919_v5 }
 0x3a4   : > { %5551 = vmatmul.mubr.msk.f32.vlgmr.msra.gmra.mrb[6].mxu1 %vm939_vm3, %v1597_v4 }
 0x3a5   : > { %5560 = vmatprep.mubr.msk.f32.mxu1 %vm5920_vm2, %v5919_v5 }
 0x3bd   : > { %v1278_v6 = vpop.xlane.xlu0 %1277 }
 0x3be   : > { %5851 = vrcp.f32 %v1278_v6 }
 0x3c1   : > { %v1755_v7 = vpop.permute.xlu0 %1754 }
 0x3c2   : > { %5559 = vmatpush3.xpose.msk.msra.mxu1 %vm939_vm3, %v1755_v7 }
 0x3c3   : > { %5568 = vmatprep.subr.mxu1 %v5919_v5 }
 0x3c5   : > { %v1753_v9 = vpop.permute.xlu0 %1752 }
 0x3c6   : > { %5561 = vmatmul.mubr.msk.f32.vlgmr.msra.gmra.mrb[8].mxu1 %vm939_vm3, %v1753_v9 }
 0x3c7   : > { %5570 = vmatprep.mubr.msk.f32.mxu1 %vm5920_vm2, %v5919_v5 }
 0x3c8   : > { %v5852_v14 = vpop.eup %5851 }
 0x3c9   : > { %v1286_v15 = vmul.f32 %v5852_v14, %v5844_v53 }
 0x3cb   : > { %5546 = vmatmul.mubr.msk.f32.vlgmr.msra.gmra.mrb[10].mxu0 %vm939_vm3, %v1286_v15 }
 0x3cc   : > { %5554 = vmatpush3.xpose.msk.msra.mxu0 %vm939_vm3, %v1677_v57  ;;  %5555 = vmatprep.mubr.msk.f32.mxu0 %vm5920_vm2, %v5919_v5 }
 0x3cd   : > { %5563 = vmatprep.subr.mxu0 %v5919_v5 }
 0x3cf   : > { %5556 = vmatmul.mubr.msk.f32.vlgmr.msra.gmra.mrb[12].mxu0 %vm939_vm3, %v1675_v13  ;;  %v936_v13 = vld [vmem:[%s6091_s14] sm:$0xff]  ;;  %s6743_s14 = sld [smem:[#allocation17_spill]] (!%p5262_p9) }
 0x3d0   : > { %5564 = vmatpush3.xpose.msk.msra.mxu0 %vm939_vm3, %v1833_v16  ;;  %5565 = vmatprep.mubr.msk.f32.mxu0 %vm5920_vm2, %v5919_v5  ;;  %v2267_v14 = vrot.slane %v936_v13, 4 }
 0x3d1   : > { %5573 = vmatprep.subr.mxu0 %v5919_v5 }
 0x3d3   : > { %5566 = vmatmul.mubr.msk.f32.vlgmr.msra.gmra.mrb[14].mxu0 %vm939_vm3, %v1831_v17 }
 0x3d4   : > { %5575 = vmatprep.mubr.msk.f32.mxu0 %vm5920_vm2, %v5919_v5 }
 0x469   : > { %v6263_v18 = vpop.f32.mrb[8].mxu0 }
 0x46a   : > { %v5537_v19 = vpop.f32.mrb[9].mxu0 }
 0x46c   : > { %v6265_v20 = vpop.f32.mrb[2].mxu1 }
 0x46d   : > { %v2353_v21 = vcombine.low %v6265_v20, %v6263_v18  ;;  %v5532_v22 = vpop.f32.mrb[3].mxu1 }
 0x470   : > { %v6269_v23 = vpop.f32.mrb[4].mxu1 }
 0x471   : > { %v5542_v24 = vpop.f32.mrb[5].mxu1 }
 0x477   : > { %v1670_v25 = vpop.f32.mrb[6].mxu1 }
 0x478   : > { %v5552_v26 = vpop.f32.mrb[7].mxu1  ;;  %v1908_v27 = vsel %vm1242_vm4, %v1670_v25, -inf }
 0x479   : > { %1909 = vmax.xlane.f32.xlu0 %v1908_v27 }
 0x499   : > { %v1826_v28 = vpop.f32.mrb[8].mxu1 }
 0x49a   : > { %v5562_v29 = vpop.f32.mrb[9].mxu1  ;;  %v1914_v30 = vsel %vm1242_vm4, %v1826_v28, -inf }
 0x49b   : > { %1915 = vmax.xlane.f32.xlu0 %v1914_v30 }
 0x49e   : > { %v6273_v31 = vpop.f32.mrb[10].mxu0 }
 0x49f   : > { %v2354_v32 = vcombine.low %v6269_v23, %v6273_v31  ;;  %v5547_v33 = vpop.f32.mrb[11].mxu0 }
 0x4a2   : > { %v1748_v34 = vpop.f32.mrb[12].mxu0 }
 0x4a3   : > { %v5557_v35 = vpop.f32.mrb[13].mxu0  ;;  %v1911_v36 = vsel %vm1242_vm4, %v1748_v34, -inf }
 0x4a4   : > { %1912 = vmax.xlane.f32.xlu1 %v1911_v36  ;;  %v5877_v35 = vld [vmem:[#allocation2 + $0x8] sm:$0xff] }
 0x4a6   : > { %v1904_v37 = vpop.f32.mrb[14].mxu0 }
 0x4a7   : > { %v5567_v38 = vpop.f32.mrb[15].mxu0  ;;  %v1917_v39 = vsel %vm1242_vm4, %v1904_v37, -inf }
 0x4a8   : > { %1918 = vmax.xlane.f32.xlu0 %v1917_v39 }
 0x4b5   : > { %1952 = vrot.lane.b32.xlu1 %v6151_v10, %s5925_s0 }
 0x506   : > { %v1910_v40 = vpop.xlane.xlu0 %1909 }
 0x507   : > { %v1920_v41 = vsub.f32 %v1670_v25, %v1910_v40 }
 0x509   : > { %v1924_v42 = vmul.f32 1.442695, %v1920_v41 }
 0x50b   : > { %5853 = vpow2.f32 %v1924_v42 }
 0x515   : > { %v5854_v43 = vpop.eup %5853 }
 0x516   : > { %v1932_v44 = vsel %vm1242_vm4, %v5854_v43, 0.0 }
 0x517   : > { %1933 = vadd.xlane.f32.xlu1 %v1932_v44 }
 0x528   : > { %v1916_v45 = vpop.xlane.xlu0 %1915 }
 0x529   : > { %v1922_v46 = vsub.f32 %v1826_v28, %v1916_v45  ;;  %v5096_v28 = vld [vmem:[%s6735_s26] ss:$0 sm:$0xff]  ;;  %s6744_s26 = sld [smem:[#allocation10_spill]] (!%p5262_p9) }
 0x52a   : > { %v2493_v45 = vld [vmem:[%s6109_s1] sm:$0xff] }
 0x52b   : > { %v1928_v47 = vmul.f32 1.442695, %v1922_v46  ;;  %v2494_v46 = vld [vmem:[%s6109_s1 + $0x8] sm:$0xff] }
 0x52d   : > { %5855 = vpow2.f32 %v1928_v47  ;;  %v5100_v47 = vcombine.high %v2493_v45, %v2493_v45 }
 0x531   : > { %v1913_v48 = vpop.xlane.xlu1 %1912 }
 0x532   : > { %v1921_v49 = vsub.f32 %v1748_v34, %v1913_v48  ;;  %v5102_v48 = vcombine.high %v2494_v46, %v2494_v46 }
 0x534   : > { %v1926_v50 = vmul.f32 1.442695, %v1921_v49  ;;  %v5099_v49 = vcombine.low %v2493_v45, %v2493_v45  ;;  %v5723_v45 = vld [vmem:[%s6121_s30 + $0x18] sm:$0xff]  }
 0x535   : > { %v1953_v51 = vpop.permute.xlu1 %1952  ;;  %v1919_v52 = vpop.xlane.xlu0 %1918 }
 0x536   : > { %5857 = vpow2.f32 %v1926_v50  ;;  %v1923_v53 = vsub.f32 %v1904_v37, %v1919_v52  ;;  %5569 = vmatpush3.msk.msra.mxu1 %vm1292_vm5, %v1953_v51  ;;  %v5878_v37 = vld [vmem:[#allocation2] sm:$0xff]  ;;  %v5101_v50 = vcombine.low %v2494_v46, %v2494_v46  ;;  %v2629_v51 = vsel %vm1292_vm5, %v5099_v49, 0  ;;  %v5724_v46 = vld [vmem:[%s6121_s30 + $0x98] sm:$0xff]  }
 0x537   : > { %v5856_v10 = vpop.eup %5855  ;;  %5578 = vmatprep.subr.mxu1 %v5919_v5  ;;  %v5727_v49 = vld [vmem:[%s6121_s30 + $0x20] sm:$0xff]  }
 0x538   : > { %v1930_v54 = vmul.f32 1.442695, %v1923_v53  ;;  %v1938_v55 = vsel %vm1242_vm4, %v5856_v10, 0.0  ;;  %v2635_v52 = vsel %vm1292_vm5, %v5101_v50, 0  ;;  %v5926_v53 = vmov 0   ;;  %v5728_v50 = vld [vmem:[%s6121_s30 + $0xa0] sm:$0xff]  }
 0x539   : > { %1939 = vadd.xlane.f32.xlu1 %v1938_v55 }
 0x53a   : > { %5859 = vpow2.f32 %v1930_v54  ;;  %v2496_v54 = vld [vmem:[%s6109_s1 + $0x18] sm:$0xff] }
 0x540   : > { %v5858_v56 = vpop.eup %5857 }
 0x541   : > { %v1935_v57 = vsel %vm1242_vm4, %v5858_v56, 0.0 }
 0x542   : > { %1936 = vadd.xlane.f32.xlu0 %v1935_v57 }
 0x544   : > { %v5860_v58 = vpop.eup %5859 }
 0x545   : > { %v1941_v59 = vsel %vm1242_vm4, %v5860_v58, 0.0 }
 0x546   : > { %1942 = vadd.xlane.f32.xlu0 %v1941_v59 }
 0x54a   : > { %2106 = vrot.lane.b32.xlu1 %v6149_v8, %s5925_s0 }
 0x54e   : > { %2183 = vrot.lane.b32.xlu1 %v6157_v11, %s5925_s0 }
 0x55c   : > { %2029 = vrot.lane.b32.xlu0 %v6161_v12, %s5925_s0  ;;  %s6739_s0 = sld [smem:[#allocation16_spill]] (!%p5262_p9) }
 0x5a4   : > { %v1934_v60 = vpop.xlane.xlu1 %1933 }
 0x5a5   : > { %5861 = vrcp.f32 %v1934_v60 }
 0x5af   : > { %v5862_v61 = vpop.eup %5861 }
 0x5b0   : > { %v1948_v62 = vmul.f32 %v5862_v61, %v5854_v43 }
 0x5b2   : > { %5571 = vmatmul.mubr.msk.f32.vlgmr.msra.gmra.mrb[10].mxu1 %vm939_vm3, %v1948_v62 }
 0x5b3   : > { %5580 = vmatprep.mubr.msk.f32.mxu1 %vm5920_vm2, %v5919_v5 }
 0x5c6   : > { %v1940_v63 = vpop.xlane.xlu1 %1939 }
 0x5c7   : > { %5863 = vrcp.f32 %v1940_v63 }
 0x5ca   : > { %v2107_v0 = vpop.permute.xlu1 %2106 }
 0x5cb   : > { %5579 = vmatpush3.msk.msra.mxu1 %vm1292_vm5, %v2107_v0 }
 0x5cc   : > { %5588 = vmatprep.subr.msk.mxu1 %vm1292_vm5, %v2267_v14 }
 0x5ce   : > { %v2184_v6 = vpop.permute.xlu1 %2183 }
 0x5cf   : > { %v1937_v8 = vpop.xlane.xlu0 %1936 }
 0x5d0   : > { %5865 = vrcp.f32 %v1937_v8  ;;  %v5097_v8 = vld [vmem:[%s6736_s15] ss:$0 sm:$0xff]  ;;  %s6745_s15 = sld [smem:[#allocation19_spill]] (!%p5262_p9) }
 0x5d1   : > { %v5864_v11 = vpop.eup %5863 }
 0x5d2   : > { %v1950_v1 = vmul.f32 %v5864_v11, %v5856_v10  ;;  %v2495_v10 = vld [vmem:[%s6109_s1 + $0x10] sm:$0xff] }
 0x5d3   : > { %v1943_v12 = vpop.xlane.xlu0 %1942  ;;  %v5104_v55 = vcombine.high %v2495_v10, %v2495_v10 }
 0x5d4   : > { %5867 = vrcp.f32 %v1943_v12  ;;  %5581 = vmatmul.mubr.msk.f32.vlgmr.msra.gmra.mrb[12].mxu1 %vm939_vm3, %v1950_v1 }
 0x5d5   : > { %5589 = vmatpush3.msk.msra.mxu1 %vm1292_vm5, %v2267_v14  ;;  %v2498_v14 = vld [vmem:[%s6109_s1 + $0x28] sm:$0xff] }
 0x5d6   : > { %5593 = vmatprep.subr.msk.mxu1 %vm1292_vm5, %v936_v13 }
 0x5d7   : > { %v2030_v2 = vpop.permute.xlu0 %2029 }
 0x5d8   : > { %5574 = vmatpush3.msk.msra.mxu0 %vm1292_vm5, %v2030_v2  ;;  %v5098_v2 = vld [vmem:[%s6737_s27] ss:$0 sm:$0xff] }
 0x5d9   : > { %5583 = vmatprep.subr.mxu0 %v5919_v5 }
 0x5da   : > { %v5866_v3 = vpop.eup %5865 }
 0x5db   : > { %v1949_v4 = vmul.f32 %v5866_v3, %v5858_v56  ;;  %v5106_v56 = vcombine.high %v2496_v54, %v2496_v54 }
 0x5dd   : > { %5576 = vmatmul.mubr.msk.f32.vlgmr.msra.gmra.mrb[16].mxu0 %vm939_vm3, %v1949_v4  ;;  %v5103_v4 = vcombine.low %v2495_v10, %v2495_v10  ;;  %v5732_v10 = vld [vmem:[%s6121_s30 + $0xa8] sm:$0xff]  }
 0x5de   : > { %v5868_v7 = vpop.eup %5867  ;;  %5584 = vmatpush3.msk.msra.mxu0 %vm1292_vm5, %v2184_v6  ;;  %5585 = vmatprep.mubr.msk.f32.mxu0 %vm5920_vm2, %v5919_v5  ;;  %v5105_v6 = vcombine.low %v2496_v54, %v2496_v54  ;;  %v5733_v54 = vld [vmem:[%s6121_s30 + $0x70] sm:$0xff]  }
 0x5df   : > { %v1951_v9 = vmul.f32 %v5868_v7, %v5860_v58  ;;  %5115 = vmatprep.subr.msk.bf16.mxu0 %vm1292_vm5, %v5100_v47  ;;  %v5725_v47 = vld [vmem:[%s6121_s30 + $0x60] sm:$0xff]  }
 0x5e1   : > { %5586 = vmatmul.mubr.msk.f32.vlgmr.msra.gmra.mrb[18].mxu0 %vm939_vm3, %v1951_v9 }
 0x5e2   : > { %2677 = vmatpush1.bf16.msra.mxu0 %v2629_v51  ;;  %2708 = vmatprep.mubr.bf16.mxu0 %v5926_v53  ;;  %v5729_v51 = vld [vmem:[%s6121_s30 + $0x68] sm:$0xff]  }
 0x5e3   : > { %5119 = vmatprep.subr.msk.bf16.mxu0 %vm1292_vm5, %v5104_v55  ;;  %v5734_v55 = vld [vmem:[%s6121_s30 + $0xf0] sm:$0xff]  }
 0x685   : > { %v2025_v15 = vpop.f32.mrb[10].mxu1 }
 0x686   : > { %v5572_v16 = vpop.f32.mrb[11].mxu1 }
 0x687   : > { %v2641_v16 = vsel %vm1292_vm5, %v5103_v4, 0  ;;  %v2501_v4 = vld [vmem:[%s6115_s17] sm:$0xff] }
 0x6a7   : > { %v2179_v17 = vpop.f32.mrb[12].mxu1 }
 0x6a8   : > { %v5582_v19 = vpop.f32.mrb[13].mxu1 }
 0x6b0   : > { %v2102_v22 = vpop.f32.mrb[16].mxu0 }
 0x6b1   : > { %v2264_v24 = vcombine.low %v2025_v15, %v2102_v22  ;;  %v5577_v25 = vpop.f32.mrb[17].mxu0  ;;  %v5110_v22 = vcombine.high %v2498_v14, %v2498_v14 }
 0x6b2   : > { %v5109_v25 = vcombine.low %v2498_v14, %v2498_v14 }
 0x6b3   : > { %5590 = vmatprep.mubr.msk.f32.mxu1 %vm939_vm3, %v2264_v24 }
 0x6b4   : > { %v2256_v5 = vpop.f32.mrb[18].mxu0 }
 0x6b5   : > { %v2265_v26 = vcombine.low %v2179_v17, %v2256_v5  ;;  %v5587_v27 = vpop.f32.mrb[19].mxu0  ;;  %v2647_v17 = vsel %vm1292_vm5, %v5105_v6, 0  ;;  %v2499_v5 = vld [vmem:[%s6109_s1 + $0x30] sm:$0xff] }
 0x6b7   : > { %5591 = vmatmul.mubr.msk.f32.vlgmr.msra.gmra.mrb[14].mxu1 %vm939_vm3, %v2265_v26  ;;  %v2500_v26 = vld [vmem:[%s6109_s1 + $0x38] sm:$0xff] }
 0x6b8   : > { %5594 = vmatpush3.msk.msra.mxu1 %vm1292_vm5, %v936_v13  ;;  %5595 = vmatprep.mubr.msk.f32.mxu1 %vm939_vm3, %v2353_v21  ;;  %v2497_v13 = vld [vmem:[%s6109_s1 + $0x20] sm:$0xff] }
 0x6b9   : > { %5117 = vmatprep.subr.msk.bf16.mxu1 %vm1292_vm5, %v5102_v48  ;;  %v5108_v19 = vcombine.high %v2497_v13, %v2497_v13  ;;  %v5107_v24 = vcombine.low %v2497_v13, %v2497_v13  ;;  %v5726_v48 = vld [vmem:[%s6121_s30 + $0xe0] sm:$0xff]  }
 0x6bb   : > { %v2653_v27 = vsel %vm1292_vm5, %v5107_v24, 0 }
 0x6bf   : > { %5596 = vmatmul.mubr.msk.f32.vlgmr.msra.gmra.mrb[14].mxu1 %vm939_vm3, %v2354_v32 }
 0x6c0   : > { %2720 = vmatpush1.bf16.msra.mxu1 %v2635_v52  ;;  %2751 = vmatprep.mubr.bf16.mxu1 %v5926_v53  ;;  %v5730_v52 = vld [vmem:[%s6121_s30 + $0xe8] sm:$0xff]  }
 0x6c1   : > { %5121 = vmatprep.subr.msk.bf16.mxu1 %vm1292_vm5, %v5106_v56  ;;  %v5735_v56 = vld [vmem:[%s6121_s30 + $0x30] sm:$0xff]  }
 0x792   : > { %v5597_v29 = vpop.f32.mrb[14].mxu1 }
 0x793   : > { %v2444_v30 = vadd.f32 %v5597_v29, %v5096_v28  ;;  %v2427_v33 = vpop.f32.mrb[15].mxu1  ;;  %v5112_v29 = vcombine.high %v2499_v5, %v2499_v5 }
 0x794   : > { %v2443_v34 = vadd.f32 %v5096_v28, %v2427_v33  ;;  %v2659_v28 = vsel %vm1292_vm5, %v5109_v25, 0  ;;  %v5111_v33 = vcombine.low %v2499_v5, %v2499_v5 }
 0x795   : > { %v2446_v36 = vadd.f32 %v5877_v35, %v2444_v30  ;;  %v5114_v30 = vcombine.high %v2500_v26, %v2500_v26 }
 0x796   : > { %v2445_v18 = vadd.f32 %v5878_v37, %v2443_v34  ;;  %v5113_v34 = vcombine.low %v2500_v26, %v2500_v26  ;;  %v2665_v35 = vsel %vm1292_vm5, %v5111_v33, 0  ;;  %v5709_v37 = vld [vmem:[%s6121_s30 + $0x40] sm:$0xff]  }
 0x797   : > { %v2452_v20 = vsel %vm844_vm1, %v2446_v36, 0.0 }
 0x798   : > { %2453 = vadd.xlane.f32.xlu1 %v2452_v20  ;;  %v2449_v21 = vsel %vm844_vm1, %v2445_v18, 0.0  ;;  %v5711_v20 = vld [vmem:[%s6121_s30] sm:$0xff]  }
 0x799   : > { %2450 = vadd.xlane.f32.xlu0 %v2449_v21  ;;  %v5712_v21 = vld [vmem:[%s6121_s30 + $0x80] sm:$0xff]  }
 0x825   : > { %v2454_v23 = vpop.xlane.xlu1 %2453 }
 0x826   : > { %v2457_v31 = vmul.f32 0.125, %v2454_v23  ;;  %v2451_v32 = vpop.xlane.xlu0 %2450  ;;  %v5713_v23 = vld [vmem:[%s6121_s30 + $0x48] sm:$0xff]  }
 0x827   : > { %v2456_v38 = vmul.f32 0.125, %v2451_v32  ;;  %v5715_v32 = vld [vmem:[%s6121_s30 + $0x8] sm:$0xff]  }
 0x828   : > { %v2459_v39 = vsub.f32 %v2446_v36, %v2457_v31  ;;  %v2671_v36 = vsel %vm1292_vm5, %v5113_v34, 0  ;;  %v5714_v31 = vld [vmem:[%s6121_s30 + $0xc8] sm:$0xff]  }
 0x829   : > { %v2458_v40 = vsub.f32 %v2445_v18, %v2456_v38  ;;  %v5710_v18 = vld [vmem:[%s6121_s30 + $0xc0] sm:$0xff]   ;;  %v5716_v38 = vld [vmem:[%s6121_s30 + $0x88] sm:$0xff]  }
 0x82a   : > { %v2461_v43 = vmul.f32 %v2459_v39, %v2459_v39 }
 0x82b   : > { %v2460_v41 = vmul.f32 %v2458_v40, %v2458_v40 }
 0x82c   : > { %v2465_v44 = vsel %vm844_vm1, %v2461_v43, 0.0  ;;  %v5721_v43 = vld [vmem:[%s6121_s30 + $0x58] sm:$0xff]  }
 0x82d   : > { %v2462_v42 = vsel %vm844_vm1, %v2460_v41, 0.0  ;;  %v5719_v41 = vld [vmem:[%s6121_s30 + $0x10] sm:$0xff]  }
 0x82e   : > { %2463 = vadd.xlane.f32.xlu0 %v2462_v42  ;;  %v5720_v42 = vld [vmem:[%s6121_s30 + $0x90] sm:$0xff]  }
 0x832   : > { %2466 = vadd.xlane.f32.xlu0 %v2465_v44  ;;  %v5722_v44 = vld [vmem:[%s6121_s30 + $0xd8] sm:$0xff]  }
 0x8bb   : > { %v2464_v57 = vpop.xlane.xlu0 %2463 }
 0x8bc   : > { %v2468_v58 = vmul.f32 0.125, %v2464_v57  ;;  %v5736_v57 = vld [vmem:[%s6121_s30 + $0xb0] sm:$0xff]  }
 0x8be   : > { %v2470_v59 = vadd.f32 1e-05, %v2468_v58  ;;  %v5737_v58 = vld [vmem:[%s6121_s30 + $0x78] sm:$0xff]  }
 0x8bf   : > { %v2467_v60 = vpop.xlane.xlu0 %2466 }
 0x8c0   : > { %5869 = vrsqrt.f32 %v2470_v59  ;;  %v2469_v61 = vmul.f32 0.125, %v2467_v60  ;;  %v5738_v59 = vld [vmem:[%s6121_s30 + $0xf8] sm:$0xff]  }
 0x8c1   : > { %v5739_v60 = vld [vmem:[%s6121_s30 + $0x38] sm:$0xff]  }
 0x8c2   : > { %v2471_v62 = vadd.f32 1e-05, %v2469_v61  ;;  %v5740_v61 = vld [vmem:[%s6121_s30 + $0xb8] sm:$0xff]  }
 0x8c4   : > { %5871 = vrsqrt.f32 %v2471_v62  ;;  %v5741_v62 = vld [vmem:[%s6121_s30 + $0x140] sm:$0xff]  }
 0x8ca   : > { %v5870_v63 = vpop.eup %5869 }
 0x8cb   : > { %v2474_v0 = vmul.f32 %v5870_v63, %v2458_v40  ;;  %v5718_v40 = vld [vmem:[%s6121_s30 + $0xd0] sm:$0xff]   ;;  %v5742_v63 = vld [vmem:[%s6121_s30 + $0x1c0] sm:$0xff]  }
 0x8cd   : > { %v2482_v1 = vmul.f32 %v5097_v8, %v2474_v0  ;;  %v2505_v0 = vlaneseq }
 0x8ce   : > { %v5872_v11 = vpop.eup %5871 }
 0x8cf   : > { %v2475_v12 = vmul.f32 %v5872_v11, %v2459_v39  ;;  %v6351_v7 = vadd.f32 %v5098_v2, %v2482_v1  ;;  %v5717_v39 = vld [vmem:[%s6121_s30 + $0x50] sm:$0xff]   ;;  %v6423_v1 = vld [vmem:[%s6115_s17 + $0x8] sm:$0xff] }
 0x8d1   : > { %v2483_v3 = vmul.f32 %v5097_v8, %v2475_v12  ;;  %v6419_v8 = vshrl.u32 %v2505_v0, 7 }
 0x8d3   : > { %v6353_v9 = vadd.f32 %v5098_v2, %v2483_v3  ;;  %v2531_v11 = vsub.s32 6, %v6419_v8  ;;  %v2507_v2 = vsub.s32 0, %v6419_v8  ;;  %v2515_v3 = vsub.s32 2, %v6419_v8 }
 0x8d4   : > { %v2511_v6 = vsub.s32 1, %v6419_v8  ;;  %v2519_v13 = vsub.s32 3, %v6419_v8  ;;  %v2527_v25 = vsub.s32 5, %v6419_v8  ;;  %v2535_v5 = vsub.s32 7, %v6419_v8 }
 0x8d5   : > { %v2492_v15 = vpack.c.bf16 %v6353_v9, %v6351_v7  ;;  %v6426_v12 = vrot.slane %v6423_v1, %v2531_v11  ;;  %v2508_v14 = vrot.slane %v2501_v4, %v2507_v2 }
 0x8d7   : > { %5116 = vmatmul.mubr.msk.bf16.vlgmr.msra.gmra.mrb[20].mxu0 %vm844_vm1, %v2492_v15  ;;  %5118 = vmatmul.mubr.msk.bf16.vlgmr.msra.gmra.mrb[16].mxu1 %vm844_vm1, %v2492_v15 }
 0x8d8   : > { %2763 = vmatpush1.bf16.msra.mxu0 %v2641_v16  ;;  %2806 = vmatpush1.bf16.msra.mxu1 %v2647_v17  ;;  %v2512_v16 = vrot.slane %v2501_v4, %v2511_v6  ;;  %v2520_v17 = vrot.slane %v2501_v4, %v2519_v13 }
 0x8d9   : > { %2794 = vmatprep.mubr.bf16.mxu0 %v5926_v53  ;;  %2837 = vmatprep.mubr.bf16.mxu1 %v5926_v53 }
 0x8da   : > { %5123 = vmatprep.subr.msk.bf16.mxu0 %vm1292_vm5, %v5108_v19  ;;  %5125 = vmatprep.subr.msk.bf16.mxu1 %vm1292_vm5, %v5110_v22  ;;  %v2523_v19 = vsub.s32 4, %v6419_v8 }
 0x8df   : > { %5120 = vmatmul.mubr.msk.bf16.vlgmr.msra.gmra.mrb[24].mxu0 %vm844_vm1, %v2492_v15  ;;  %5122 = vmatmul.mubr.msk.bf16.vlgmr.msra.gmra.mrb[20].mxu1 %vm844_vm1, %v2492_v15 }
 0x8e0   : > { %2849 = vmatpush1.bf16.msra.mxu0 %v2653_v27  ;;  %2892 = vmatpush1.bf16.msra.mxu1 %v2659_v28 }
 0x8e1   : > { %2880 = vmatprep.mubr.bf16.mxu0 %v5926_v53  ;;  %2923 = vmatprep.mubr.bf16.mxu1 %v5926_v53 }
 0x8e2   : > { %5127 = vmatprep.subr.msk.bf16.mxu0 %vm1292_vm5, %v5112_v29  ;;  %5129 = vmatprep.subr.msk.bf16.mxu1 %vm1292_vm5, %v5114_v30 }
 0x8e7   : > { %5124 = vmatmul.mubr.msk.bf16.vlgmr.msra.gmra.mrb[28].mxu0 %vm844_vm1, %v2492_v15  ;;  %5126 = vmatmul.mubr.msk.bf16.vlgmr.msra.gmra.mrb[24].mxu1 %vm844_vm1, %v2492_v15 }
 0x8e8   : > { %2935 = vmatpush1.bf16.msra.mxu0 %v2665_v35  ;;  %2978 = vmatpush1.bf16.msra.mxu1 %v2671_v36 }
 0x8e9   : > { %2966 = vmatprep.mubr.bf16.mxu0 %v5926_v53  ;;  %3009 = vmatprep.mubr.bf16.mxu1 %v5926_v53  ;;  %v5731_v53 = vld [vmem:[%s6121_s30 + $0x28] sm:$0xff]  }
 0x8ea   : > { %5314 = vmatprep.subr.bf16.mxu0 %v5709_v37  ;;  %5336 = vmatprep.subr.bf16.mxu1 %v5710_v18 }
 0x8ef   : > { %5128 = vmatmul.mubr.msk.bf16.vlgmr.msra.gmra.mrb[32].mxu0 %vm844_vm1, %v2492_v15  ;;  %5130 = vmatmul.mubr.msk.bf16.vlgmr.msra.gmra.mrb[28].mxu1 %vm844_vm1, %v2492_v15  ;;  %v2516_v15 = vrot.slane %v2501_v4, %v2515_v3 }
 0x8f0   : > { %5315 = vmatpush3.bf16.msra.mxu0 %v5711_v20  ;;  %5337 = vmatpush3.bf16.msra.mxu1 %v5712_v21  ;;  %v2524_v21 = vrot.slane %v2501_v4, %v2523_v19 }
 0x8f1   : > { %5316 = vmatprep.subr.bf16.mxu0 %v5713_v23  ;;  %5338 = vmatprep.subr.bf16.mxu1 %v5714_v31  ;;  %v2532_v23 = vrot.slane %v2501_v4, %v2531_v11 }
 0x8f4   : > { %5317 = vmatpush3.bf16.msra.mxu0 %v5715_v32  ;;  %5339 = vmatpush3.bf16.msra.mxu1 %v5716_v38  ;;  %v2528_v38 = vrot.slane %v2501_v4, %v2527_v25 }
 0x8f5   : > { %5318 = vmatprep.subr.bf16.mxu0 %v5717_v39  ;;  %5340 = vmatprep.subr.bf16.mxu1 %v5718_v40  ;;  %v2536_v39 = vrot.slane %v2501_v4, %v2535_v5  ;;  %v2548_v4 = vrot.slane %v6423_v1, %v2515_v3  ;;  %v2552_v3 = vrot.slane %v6423_v1, %v2519_v13 }
 0x8f8   : > { %5319 = vmatpush3.bf16.msra.mxu0 %v5719_v41  ;;  %5341 = vmatpush3.bf16.msra.mxu1 %v5720_v42 }
 0x8f9   : > { %5320 = vmatprep.subr.bf16.mxu0 %v5721_v43  ;;  %5342 = vmatprep.subr.bf16.mxu1 %v5722_v44 }
 0x8fc   : > { %5321 = vmatpush3.bf16.msra.mxu0 %v5723_v45  ;;  %5343 = vmatpush3.bf16.msra.mxu1 %v5724_v46 }
 0x8fd   : > { %5322 = vmatprep.subr.bf16.mxu0 %v5725_v47  ;;  %5344 = vmatprep.subr.bf16.mxu1 %v5726_v48 }
 0x900   : > { %5323 = vmatpush3.bf16.msra.mxu0 %v5727_v49  ;;  %5345 = vmatpush3.bf16.msra.mxu1 %v5728_v50 }
 0x901   : > { %5324 = vmatprep.subr.bf16.mxu0 %v5729_v51  ;;  %5346 = vmatprep.subr.bf16.mxu1 %v5730_v52 }
 0x904   : > { %5325 = vmatpush3.bf16.msra.mxu0 %v5731_v53  ;;  %5347 = vmatpush3.bf16.msra.mxu1 %v5732_v10  ;;  %v5743_v10 = vld [vmem:[%s6121_s30 + $0x100] sm:$0xff]  }
 0x905   : > { %5326 = vmatprep.subr.bf16.mxu0 %v5733_v54  ;;  %5348 = vmatprep.subr.bf16.mxu1 %v5734_v55  ;;  %v5744_v54 = vld [vmem:[%s6121_s30 + $0x180] sm:$0xff]  }
 0x908   : > { %5327 = vmatpush3.bf16.msra.mxu0 %v5735_v56  ;;  %5349 = vmatpush3.bf16.msra.mxu1 %v5736_v57 }
 0x909   : > { %5328 = vmatprep.subr.bf16.mxu0 %v5737_v58  ;;  %5350 = vmatprep.subr.bf16.mxu1 %v5738_v59  ;;  %v5745_v59 = vld [vmem:[%s6121_s30 + $0x148] sm:$0xff]  }
 0x90c   : > { %5329 = vmatpush3.bf16.msra.mxu0 %v5739_v60  ;;  %5351 = vmatpush3.bf16.msra.mxu1 %v5740_v61  ;;  %v5746_v60 = vld [vmem:[%s6121_s30 + $0x1c8] sm:$0xff]   ;;  %v2540_v61 = vrot.slane %v6423_v1, %v2507_v2  ;;  %v2544_v2 = vrot.slane %v6423_v1, %v2511_v6  ;;  %v5750_v6 = vld [vmem:[%s6121_s30 + $0x1d0] sm:$0xff]  }
 0x90d   : > { %5358 = vmatprep.subr.bf16.mxu0 %v5741_v62  ;;  %5380 = vmatprep.subr.bf16.mxu1 %v5742_v63 }
 0x9aa   : > { %v2710_v22 = vpop.f32.mrb[20].mxu0  ;;  %v2753_v24 = vpop.f32.mrb[16].mxu1 }
 0x9ab   : > { %v2711_v26 = vadd.f32 %v2710_v22, %v2508_v14  ;;  %v2754_v27 = vadd.f32 %v2753_v24, %v2516_v15  ;;  %v2712_v28 = vpop.f32.mrb[21].mxu0  ;;  %v2755_v29 = vpop.f32.mrb[17].mxu1 }
 0x9ac   : > { %v2713_v30 = vadd.f32 %v2712_v28, %v2512_v16  ;;  %v2756_v33 = vadd.f32 %v2755_v29, %v2520_v17  ;;  %v2714_v34 = vpop.f32.mrb[22].mxu0  ;;  %v2757_v35 = vpop.f32.mrb[18].mxu1 }
 0x9ad   : > { %v2715_v36 = vadd.f32 %v2714_v34, %v2508_v14  ;;  %v2758_v37 = vadd.f32 %v2757_v35, %v2516_v15  ;;  %v2716_v18 = vpop.f32.mrb[23].mxu0  ;;  %v2759_v20 = vpop.f32.mrb[19].mxu1  ;;  %v3020_v40 = vmax.f32 %v2711_v26, 0.0  ;;  %v3022_v41 = vmax.f32 %v2754_v27, 0.0  ;;  %v5747_v26 = vld [vmem:[%s6121_s30 + $0x108] sm:$0xff]   ;;  %v5749_v34 = vld [vmem:[%s6121_s30 + $0x150] sm:$0xff]  }
 0x9ae   : > { %v2717_v31 = vadd.f32 %v2716_v18, %v2512_v16  ;;  %v2760_v32 = vadd.f32 %v2759_v20, %v2520_v17  ;;  %v3021_v44 = vmax.f32 %v2713_v30, 0.0  ;;  %v3023_v45 = vmax.f32 %v2756_v33, 0.0  ;;  %v5748_v27 = vld [vmem:[%s6121_s30 + $0x188] sm:$0xff]  }
 0x9af   : > { %v3036_v42 = vmax.f32 %v2715_v36, 0.0  ;;  %v3038_v43 = vmax.f32 %v2758_v37, 0.0 }
 0x9b0   : > { %v3037_v46 = vmax.f32 %v2717_v31, 0.0  ;;  %v3039_v47 = vmax.f32 %v2760_v32, 0.0 }
 0x9b1   : > { %v3052_v48 = vpack.c.bf16 %v3036_v42, %v3020_v40  ;;  %v3054_v49 = vpack.c.bf16 %v3038_v43, %v3022_v41 }
 0x9b2   : > { %v3053_v50 = vpack.c.bf16 %v3037_v46, %v3021_v44  ;;  %v3055_v51 = vpack.c.bf16 %v3039_v47, %v3023_v45  ;;  %v2796_v52 = vpop.f32.mrb[24].mxu0  ;;  %v2839_v53 = vpop.f32.mrb[20].mxu1  ;;  %v5753_v44 = vld [vmem:[%s6121_s30 + $0x158] sm:$0xff]  }
 0x9b3   : > { %v2797_v55 = vadd.f32 %v2796_v52, %v2524_v21  ;;  %v2840_v56 = vadd.f32 %v2839_v53, %v2532_v23  ;;  %v2798_v57 = vpop.f32.mrb[25].mxu0  ;;  %v2841_v58 = vpop.f32.mrb[21].mxu1  ;;  %v5754_v45 = vld [vmem:[%s6121_s30 + $0x1d8] sm:$0xff]  }
 0x9b4   : > { %v2799_v62 = vadd.f32 %v2798_v57, %v2528_v38  ;;  %v2842_v63 = vadd.f32 %v2841_v58, %v2536_v39  ;;  %v2800_v0 = vpop.f32.mrb[26].mxu0  ;;  %v2843_v11 = vpop.f32.mrb[22].mxu1  ;;  %4131 = vmatprep.mubr.bf16.mxu0 %v3053_v50  ;;  %4172 = vmatprep.mubr.bf16.mxu1 %v3055_v51  ;;  %v5755_v57 = vld [vmem:[%s6121_s30 + $0x118] sm:$0xff]  }
 0x9b5   : > { %v2801_v14 = vadd.f32 %v2800_v0, %v2524_v21  ;;  %v2844_v15 = vadd.f32 %v2843_v11, %v2532_v23  ;;  %v2802_v16 = vpop.f32.mrb[27].mxu0  ;;  %v2845_v17 = vpop.f32.mrb[23].mxu1  ;;  %4132 = vmatmul.mubr.bf16.vlgmr.msra.gmra.mrb[36].mxu0 %v3052_v48  ;;  %4173 = vmatmul.mubr.bf16.vlgmr.msra.gmra.mrb[32].mxu1 %v3054_v49  ;;  %v3024_v28 = vmax.f32 %v2797_v55, 0.0  ;;  %v3026_v29 = vmax.f32 %v2840_v56, 0.0  ;;  %v5756_v58 = vld [vmem:[%s6121_s30 + $0x198] sm:$0xff]  }
 0x9b6   : > { %v2803_v22 = vadd.f32 %v2802_v16, %v2528_v38  ;;  %v2846_v24 = vadd.f32 %v2845_v17, %v2536_v39  ;;  %5359 = vmatpush3.bf16.msra.mxu0 %v5743_v10  ;;  %5381 = vmatpush3.bf16.msra.mxu1 %v5744_v54  ;;  %v3025_v35 = vmax.f32 %v2799_v62, 0.0  ;;  %v3027_v36 = vmax.f32 %v2842_v63, 0.0  ;;  %v5751_v38 = vld [vmem:[%s6121_s30 + $0x110] sm:$0xff]  }
 0x9b7   : > { %v3040_v30 = vmax.f32 %v2801_v14, 0.0  ;;  %v3042_v33 = vmax.f32 %v2844_v15, 0.0  ;;  %5360 = vmatprep.subr.bf16.mxu0 %v5745_v59  ;;  %5382 = vmatprep.subr.bf16.mxu1 %v5746_v60  ;;  %v5752_v39 = vld [vmem:[%s6121_s30 + $0x190] sm:$0xff]   ;;  %v2556_v10 = vrot.slane %v6423_v1, %v2523_v19  ;;  %v2560_v54 = vrot.slane %v6423_v1, %v2527_v25  ;;  %v5757_v19 = vld [vmem:[%s6121_s30 + $0x160] sm:$0xff]  }
 0x9b8   : > { %v3041_v37 = vmax.f32 %v2803_v22, 0.0  ;;  %v3043_v18 = vmax.f32 %v2846_v24, 0.0  ;;  %v2568_v59 = vrot.slane %v6423_v1, %v2535_v5  ;;  %v5758_v25 = vld [vmem:[%s6121_s30 + $0x1e0] sm:$0xff]  }
 0x9b9   : > { %v6462_v20 = vpack.c.bf16 %v3040_v30, %v3024_v28  ;;  %v6464_v21 = vpack.c.bf16 %v3042_v33, %v3026_v29  ;;  %v5759_v22 = vld [vmem:[%s6121_s30 + $0x120] sm:$0xff]   ;;  %v5761_v29 = vld [vmem:[%s6121_s30 + $0x168] sm:$0xff]  }
 0x9ba   : > { %v3057_v13 = vpack.c.bf16 %v3041_v37, %v3025_v35  ;;  %v3059_v23 = vpack.c.bf16 %v3043_v18, %v3027_v36  ;;  %5361 = vmatpush3.bf16.msra.mxu0 %v5747_v26  ;;  %5383 = vmatpush3.bf16.msra.mxu1 %v5748_v27  ;;  %v2882_v31 = vpop.f32.mrb[28].mxu0  ;;  %v2925_v32 = vpop.f32.mrb[24].mxu1  ;;  %v5760_v24 = vld [vmem:[%s6121_s30 + $0x1a0] sm:$0xff]   ;;  %v5762_v30 = vld [vmem:[%s6121_s30 + $0x1e8] sm:$0xff]  }
 0x9bb   : > { %v2883_v40 = vadd.f32 %v2882_v31, %v2540_v61  ;;  %v2926_v41 = vadd.f32 %v2925_v32, %v2548_v4  ;;  %v2884_v42 = vpop.f32.mrb[29].mxu0  ;;  %v2927_v43 = vpop.f32.mrb[25].mxu1  ;;  %5362 = vmatprep.subr.bf16.mxu0 %v5749_v34  ;;  %5384 = vmatprep.subr.bf16.mxu1 %v5750_v6  ;;  %v5763_v32 = vld [vmem:[%s6121_s30 + $0x128] sm:$0xff]  }
 0x9bc   : > { %v2885_v46 = vadd.f32 %v2884_v42, %v2544_v2  ;;  %v2928_v47 = vadd.f32 %v2927_v43, %v2552_v3  ;;  %v2886_v48 = vpop.f32.mrb[30].mxu0  ;;  %v2929_v49 = vpop.f32.mrb[26].mxu1  ;;  %4213 = vmatprep.mubr.bf16.mxu0 %v3057_v13  ;;  %4254 = vmatprep.mubr.bf16.mxu1 %v3059_v23  ;;  %v5765_v43 = vld [vmem:[%s6121_s30 + $0x170] sm:$0xff]  }
 0x9bd   : > { %v2887_v50 = vadd.f32 %v2886_v48, %v2540_v61  ;;  %v2930_v51 = vadd.f32 %v2929_v49, %v2548_v4  ;;  %v2888_v52 = vpop.f32.mrb[31].mxu0  ;;  %v2931_v53 = vpop.f32.mrb[27].mxu1  ;;  %v3028_v60 = vmax.f32 %v2883_v40, 0.0  ;;  %v3030_v61 = vmax.f32 %v2926_v41, 0.0 }
 0x9be   : > { %v2889_v55 = vadd.f32 %v2888_v52, %v2544_v2  ;;  %v2932_v56 = vadd.f32 %v2931_v53, %v2552_v3  ;;  %5363 = vmatpush3.bf16.msra.mxu0 %v5751_v38  ;;  %5385 = vmatpush3.bf16.msra.mxu1 %v5752_v39  ;;  %v3029_v0 = vmax.f32 %v2885_v46, 0.0  ;;  %v3031_v11 = vmax.f32 %v2928_v47, 0.0  ;;  %v5764_v38 = vld [vmem:[%s6121_s30 + $0x1a8] sm:$0xff]   ;;  %v5767_v52 = vld [vmem:[%s6121_s30 + $0x130] sm:$0xff]  }
 0x9bf   : > { %v3044_v62 = vmax.f32 %v2887_v50, 0.0  ;;  %v3046_v63 = vmax.f32 %v2930_v51, 0.0  ;;  %5364 = vmatprep.subr.bf16.mxu0 %v5753_v44  ;;  %5386 = vmatprep.subr.bf16.mxu1 %v5754_v45  ;;  %v5768_v53 = vld [vmem:[%s6121_s30 + $0x1b0] sm:$0xff]  }
 0x9c0   : > { %v3045_v4 = vmax.f32 %v2889_v55, 0.0  ;;  %v3047_v14 = vmax.f32 %v2932_v56, 0.0  ;;  %v5771_v55 = vld [vmem:[%s6121_s30 + $0x138] sm:$0xff]  }
 0x9c1   : > { %v6483_v15 = vpack.c.bf16 %v3044_v62, %v3028_v60  ;;  %v6485_v16 = vpack.c.bf16 %v3046_v63, %v3030_v61  ;;  %v5772_v56 = vld [vmem:[%s6121_s30 + $0x1b8] sm:$0xff]   ;;  %v5776_v60 = vld [vmem:[%s6121_s30 + $0x280] sm:$0xff]   ;;  %v5777_v61 = vld [vmem:[%s6121_s30 + $0x248] sm:$0xff]  }
 0x9c2   : > { %v6487_v1 = vpack.c.bf16 %v3045_v4, %v3029_v0  ;;  %v6489_v5 = vpack.c.bf16 %v3047_v14, %v3031_v11  ;;  %5365 = vmatpush3.bf16.msra.mxu0 %v5755_v57  ;;  %5387 = vmatpush3.bf16.msra.mxu1 %v5756_v58  ;;  %v2968_v17 = vpop.f32.mrb[32].mxu0  ;;  %v3011_v2 = vpop.f32.mrb[28].mxu1  ;;  %v5773_v57 = vld [vmem:[%s6121_s30 + $0x240] sm:$0xff]   ;;  %v5778_v62 = vld [vmem:[%s6121_s30 + $0x2c8] sm:$0xff]   ;;  %v5784_v0 = vld [vmem:[%s6121_s30 + $0x290] sm:$0xff]  }
 0x9c3   : > { %v2969_v26 = vadd.f32 %v2968_v17, %v2556_v10  ;;  %v3012_v27 = vadd.f32 %v3011_v2, %v6426_v12  ;;  %v2970_v3 = vpop.f32.mrb[33].mxu0  ;;  %v3013_v28 = vpop.f32.mrb[29].mxu1  ;;  %5366 = vmatprep.subr.bf16.mxu0 %v5757_v19  ;;  %5388 = vmatprep.subr.bf16.mxu1 %v5758_v25  ;;  %v5774_v58 = vld [vmem:[%s6121_s30 + $0x2c0] sm:$0xff]   ;;  %v5779_v63 = vld [vmem:[%s6121_s30 + $0x208] sm:$0xff]   ;;  %v5781_v25 = vld [vmem:[%s6121_s30 + $0x250] sm:$0xff]  }
 0x9c4   : > { %v2971_v33 = vadd.f32 %v2970_v3, %v2560_v54  ;;  %v3014_v34 = vadd.f32 %v3013_v28, %v2568_v59  ;;  %v2972_v6 = vpop.f32.mrb[34].mxu0  ;;  %v3015_v35 = vpop.f32.mrb[30].mxu1  ;;  %v5780_v19 = vld [vmem:[%s6121_s30 + $0x288] sm:$0xff]   ;;  %v5785_v11 = vld [vmem:[%s6121_s30 + $0x258] sm:$0xff]   ;;  %v5790_v17 = vld [vmem:[%s6121_s30 + $0x2e0] sm:$0xff]  }
 0x9c5   : > { %v2973_v36 = vadd.f32 %v2972_v6, %v2556_v10  ;;  %v3016_v37 = vadd.f32 %v3015_v35, %v6426_v12  ;;  %v2974_v18 = vpop.f32.mrb[35].mxu0  ;;  %v3017_v13 = vpop.f32.mrb[31].mxu1  ;;  %v3032_v39 = vmax.f32 %v2969_v26, 0.0  ;;  %v3034_v40 = vmax.f32 %v3012_v27, 0.0  ;;  %v5766_v12 = vld [vmem:[%s6121_s30 + $0x1f0] sm:$0xff]   ;;  %v5769_v10 = vld [vmem:[%s6121_s30 + $0x178] sm:$0xff]  }
 0x9c6   : > { %v2975_v23 = vadd.f32 %v2974_v18, %v2560_v54  ;;  %v3018_v31 = vadd.f32 %v3017_v13, %v2568_v59  ;;  %5367 = vmatpush3.bf16.msra.mxu0 %v5759_v22  ;;  %5389 = vmatpush3.bf16.msra.mxu1 %v5760_v24  ;;  %v3033_v44 = vmax.f32 %v2971_v33, 0.0  ;;  %v3035_v45 = vmax.f32 %v3014_v34, 0.0  ;;  %v5770_v54 = vld [vmem:[%s6121_s30 + $0x1f8] sm:$0xff]   ;;  %v5775_v59 = vld [vmem:[%s6121_s30 + $0x200] sm:$0xff]   ;;  %v5793_v24 = vld [vmem:[%s6121_s30 + $0x268] sm:$0xff]  }
 0x9c7   : > { %v3048_v41 = vmax.f32 %v2973_v36, 0.0  ;;  %v3050_v42 = vmax.f32 %v3016_v37, 0.0  ;;  %5368 = vmatprep.subr.bf16.mxu0 %v5761_v29  ;;  %5390 = vmatprep.subr.bf16.mxu1 %v5762_v30  ;;  %v5786_v4 = vld [vmem:[%s6121_s30 + $0x2d8] sm:$0xff]   ;;  %v5791_v2 = vld [vmem:[%s6121_s30 + $0x220] sm:$0xff]   ;;  %v5794_v26 = vld [vmem:[%s6121_s30 + $0x2e8] sm:$0xff]  }
 0x9c8   : > { %v3049_v46 = vmax.f32 %v2975_v23, 0.0  ;;  %v3051_v47 = vmax.f32 %v3018_v31, 0.0  ;;  %v5787_v14 = vld [vmem:[%s6121_s30 + $0x218] sm:$0xff]   ;;  %v5792_v22 = vld [vmem:[%s6121_s30 + $0x2a0] sm:$0xff]   ;;  %v5795_v27 = vld [vmem:[%s6121_s30 + $0x228] sm:$0xff]  }
 0x9c9   : > { %v6501_v48 = vpack.c.bf16 %v3048_v41, %v3032_v39  ;;  %v6503_v49 = vpack.c.bf16 %v3050_v42, %v3034_v40  ;;  %v5796_v3 = vld [vmem:[%s6121_s30 + $0x2a8] sm:$0xff]   ;;  %v5797_v28 = vld [vmem:[%s6121_s30 + $0x270] sm:$0xff]   ;;  %v5801_v34 = vld [vmem:[%s6121_s30 + $0x278] sm:$0xff]  }
 0x9ca   : > { %v6505_v50 = vpack.c.bf16 %v3049_v46, %v3033_v44  ;;  %v6507_v51 = vpack.c.bf16 %v3051_v47, %v3035_v45  ;;  %5369 = vmatpush3.bf16.msra.mxu0 %v5763_v32  ;;  %5391 = vmatpush3.bf16.msra.mxu1 %v5764_v38  ;;  %v5798_v29 = vld [vmem:[%s6121_s30 + $0x2f0] sm:$0xff]   ;;  %v5802_v6 = vld [vmem:[%s6121_s30 + $0x2f8] sm:$0xff]   ;;  %v5805_v37 = vld [vmem:[%s6121_s30 + $0x340] sm:$0xff]  }
 0x9cb   : > { %5370 = vmatprep.subr.bf16.mxu0 %v5765_v43  ;;  %5392 = vmatprep.subr.bf16.mxu1 %v5766_v12  ;;  %v5799_v30 = vld [vmem:[%s6121_s30 + $0x230] sm:$0xff]   ;;  %v5803_v35 = vld [vmem:[%s6121_s30 + $0x238] sm:$0xff]   ;;  %v5806_v18 = vld [vmem:[%s6121_s30 + $0x3c0] sm:$0xff]  }
 0x9cc   : > { %v5800_v33 = vld [vmem:[%s6121_s30 + $0x2b0] sm:$0xff]   ;;  %v5804_v36 = vld [vmem:[%s6121_s30 + $0x2b8] sm:$0xff]   ;;  %v5807_v13 = vld [vmem:[%s6121_s30 + $0x300] sm:$0xff]  }
 0x9cd   : > { %v5808_v23 = vld [vmem:[%s6121_s30 + $0x380] sm:$0xff]   ;;  %v5809_v31 = vld [vmem:[%s6121_s30 + $0x348] sm:$0xff]   ;;  %v5813_v40 = vld [vmem:[%s6121_s30 + $0x350] sm:$0xff]  }
 0x9ce   : > { %5371 = vmatpush3.bf16.msra.mxu0 %v5767_v52  ;;  %5393 = vmatpush3.bf16.msra.mxu1 %v5768_v53  ;;  %v5810_v32 = vld [vmem:[%s6121_s30 + $0x3c8] sm:$0xff]   ;;  %v5816_v41 = vld [vmem:[%s6121_s30 + $0x390] sm:$0xff]   ;;  %v5817_v42 = vld [vmem:[%s6121_s30 + $0x358] sm:$0xff]  }
 0x9cf   : > { %5372 = vmatprep.subr.bf16.mxu0 %v5769_v10  ;;  %5394 = vmatprep.subr.bf16.mxu1 %v5770_v54  ;;  %v5811_v38 = vld [vmem:[%s6121_s30 + $0x308] sm:$0xff]   ;;  %v5818_v43 = vld [vmem:[%s6121_s30 + $0x3d8] sm:$0xff]   ;;  %v5821_v45 = vld [vmem:[%s6121_s30 + $0x360] sm:$0xff]  }
 0x9d0   : > { %v5812_v39 = vld [vmem:[%s6121_s30 + $0x388] sm:$0xff]   ;;  %v5819_v12 = vld [vmem:[%s6121_s30 + $0x318] sm:$0xff]   ;;  %v5822_v46 = vld [vmem:[%s6121_s30 + $0x3e0] sm:$0xff]  }
 0x9d1   : > { %v5820_v44 = vld [vmem:[%s6121_s30 + $0x398] sm:$0xff]   ;;  %v5823_v47 = vld [vmem:[%s6121_s30 + $0x320] sm:$0xff]   ;;  %v5826_v52 = vld [vmem:[%s6121_s30 + $0x3e8] sm:$0xff]  }
 0x9d2   : > { %5373 = vmatpush3.bf16.msra.mxu0 %v5771_v55  ;;  %5395 = vmatpush3.bf16.msra.mxu1 %v5772_v56  ;;  %v5827_v53 = vld [vmem:[%s6121_s30 + $0x328] sm:$0xff]   ;;  %v5829_v54 = vld [vmem:[%s6121_s30 + $0x370] sm:$0xff]  }
 0x9d3   : > { %5402 = vmatprep.subr.bf16.mxu0 %v5773_v57  ;;  %5424 = vmatprep.subr.bf16.mxu1 %v5774_v58  ;;  %v5828_v10 = vld [vmem:[%s6121_s30 + $0x3a8] sm:$0xff]   ;;  %v5830_v55 = vld [vmem:[%s6121_s30 + $0x3f0] sm:$0xff]   ;;  %v5833_v58 = vld [vmem:[%s6121_s30 + $0x378] sm:$0xff]  }
 0x9d4   : > { %v5831_v56 = vld [vmem:[%s6121_s30 + $0x330] sm:$0xff]  }
 0x9d5   : > { %4214 = vmatmul.mubr.bf16.vlgmr.msra.gmra.mrb[40].mxu0 %v6462_v20  ;;  %4255 = vmatmul.mubr.bf16.vlgmr.msra.gmra.mrb[36].mxu1 %v6464_v21  ;;  %v5782_v20 = vld [vmem:[%s6121_s30 + $0x2d0] sm:$0xff]  }
 0x9d6   : > { %5403 = vmatpush3.bf16.msra.mxu0 %v5775_v59  ;;  %4295 = vmatprep.mubr.bf16.mxu0 %v6487_v1  ;;  %v5783_v21 = vld [vmem:[%s6121_s30 + $0x210] sm:$0xff]   ;;  %v5788_v1 = vld [vmem:[%s6121_s30 + $0x298] sm:$0xff]  }
 0x9d7   : > { %5425 = vmatpush3.bf16.msra.mxu1 %v5776_v60  ;;  %4336 = vmatprep.mubr.bf16.mxu1 %v6489_v5  ;;  %v5789_v5 = vld [vmem:[%s6121_s30 + $0x260] sm:$0xff]   ;;  %v5832_v57 = vld [vmem:[%s6121_s30 + $0x3b0] sm:$0xff]   ;;  %v5834_v59 = vld [vmem:[%s6121_s30 + $0x3f8] sm:$0xff]  }
 0x9d8   : > { %5404 = vmatprep.subr.bf16.mxu0 %v5777_v61  ;;  %5426 = vmatprep.subr.bf16.mxu1 %v5778_v62  ;;  %v5835_v60 = vld [vmem:[%s6121_s30 + $0x338] sm:$0xff]  }
 0x9d9   : > { %v5836_v61 = vld [vmem:[%s6121_s30 + $0x3b8] sm:$0xff]  }
 0x9da   : > { %5405 = vmatpush3.bf16.msra.mxu0 %v5779_v63 }
 0x9db   : > { %5427 = vmatpush3.bf16.msra.mxu1 %v5780_v19  ;;  %5406 = vmatprep.subr.bf16.mxu0 %v5781_v25  ;;  %v5131_v19 = vld [vmem:[%s812_s23] ss:$0 sm:$0xff] }
 0x9dc   : > { %5428 = vmatprep.subr.bf16.mxu1 %v5782_v20 }
 0x9de   : > { %5407 = vmatpush3.bf16.msra.mxu0 %v5783_v21 }
 0x9df   : > { %5429 = vmatpush3.bf16.msra.mxu1 %v5784_v0  ;;  %5408 = vmatprep.subr.bf16.mxu0 %v5785_v11 }
 0x9e0   : > { %5430 = vmatprep.subr.bf16.mxu1 %v5786_v4 }
 0x9e2   : > { %5409 = vmatpush3.bf16.msra.mxu0 %v5787_v14 }
 0x9e3   : > { %5431 = vmatpush3.bf16.msra.mxu1 %v5788_v1  ;;  %5410 = vmatprep.subr.bf16.mxu0 %v5789_v5 }
 0x9e4   : > { %5432 = vmatprep.subr.bf16.mxu1 %v5790_v17 }
 0x9e6   : > { %5411 = vmatpush3.bf16.msra.mxu0 %v5791_v2 }
 0x9e7   : > { %5433 = vmatpush3.bf16.msra.mxu1 %v5792_v22  ;;  %5412 = vmatprep.subr.bf16.mxu0 %v5793_v24 }
 0x9e8   : > { %5434 = vmatprep.subr.bf16.mxu1 %v5794_v26 }
 0x9ea   : > { %5413 = vmatpush3.bf16.msra.mxu0 %v5795_v27 }
 0x9eb   : > { %5435 = vmatpush3.bf16.msra.mxu1 %v5796_v3  ;;  %5414 = vmatprep.subr.bf16.mxu0 %v5797_v28 }
 0x9ec   : > { %5436 = vmatprep.subr.bf16.mxu1 %v5798_v29 }
 0x9ee   : > { %5415 = vmatpush3.bf16.msra.mxu0 %v5799_v30 }
 0x9ef   : > { %5437 = vmatpush3.bf16.msra.mxu1 %v5800_v33  ;;  %5416 = vmatprep.subr.bf16.mxu0 %v5801_v34 }
 0x9f0   : > { %5438 = vmatprep.subr.bf16.mxu1 %v5802_v6 }
 0x9f2   : > { %5417 = vmatpush3.bf16.msra.mxu0 %v5803_v35 }
 0x9f3   : > { %5439 = vmatpush3.bf16.msra.mxu1 %v5804_v36  ;;  %5446 = vmatprep.subr.bf16.mxu0 %v5805_v37 }
 0x9f4   : > { %5468 = vmatprep.subr.bf16.mxu1 %v5806_v18 }
 0x9f5   : > { %4296 = vmatmul.mubr.bf16.vlgmr.msra.gmra.mrb[44].mxu0 %v6483_v15  ;;  %v5814_v15 = vld [vmem:[%s6121_s30 + $0x3d0] sm:$0xff]  }
 0x9f6   : > { %4337 = vmatmul.mubr.bf16.vlgmr.msra.gmra.mrb[40].mxu1 %v6485_v16  ;;  %5447 = vmatpush3.bf16.msra.mxu0 %v5807_v13  ;;  %v5815_v16 = vld [vmem:[%s6121_s30 + $0x310] sm:$0xff]  }
 0x9f7   : > { %4377 = vmatprep.mubr.bf16.mxu0 %v6505_v50  ;;  %5469 = vmatpush3.bf16.msra.mxu1 %v5808_v23  ;;  %v5824_v50 = vld [vmem:[%s6121_s30 + $0x3a0] sm:$0xff]  }
 0x9f8   : > { %4418 = vmatprep.mubr.bf16.mxu1 %v6507_v51  ;;  %5448 = vmatprep.subr.bf16.mxu0 %v5809_v31  ;;  %v5825_v51 = vld [vmem:[%s6121_s30 + $0x368] sm:$0xff]  }
 0x9f9   : > { %5470 = vmatprep.subr.bf16.mxu1 %v5810_v32 }
 0x9fa   : > { %5449 = vmatpush3.bf16.msra.mxu0 %v5811_v38 }
 0x9fb   : > { %5471 = vmatpush3.bf16.msra.mxu1 %v5812_v39  ;;  %5450 = vmatprep.subr.bf16.mxu0 %v5813_v40 }
 0x9fc   : > { %5472 = vmatprep.subr.bf16.mxu1 %v5814_v15 }
 0x9fe   : > { %5451 = vmatpush3.bf16.msra.mxu0 %v5815_v16 }
 0x9ff   : > { %5473 = vmatpush3.bf16.msra.mxu1 %v5816_v41  ;;  %5452 = vmatprep.subr.bf16.mxu0 %v5817_v42 }
 0xa00   : > { %5474 = vmatprep.subr.bf16.mxu1 %v5818_v43 }
 0xa02   : > { %5453 = vmatpush3.bf16.msra.mxu0 %v5819_v12 }
 0xa03   : > { %5475 = vmatpush3.bf16.msra.mxu1 %v5820_v44  ;;  %5454 = vmatprep.subr.bf16.mxu0 %v5821_v45 }
 0xa04   : > { %5476 = vmatprep.subr.bf16.mxu1 %v5822_v46 }
 0xa06   : > { %5455 = vmatpush3.bf16.msra.mxu0 %v5823_v47 }
 0xa07   : > { %5477 = vmatpush3.bf16.msra.mxu1 %v5824_v50  ;;  %5456 = vmatprep.subr.bf16.mxu0 %v5825_v51 }
 0xa08   : > { %5478 = vmatprep.subr.bf16.mxu1 %v5826_v52 }
 0xa0a   : > { %5457 = vmatpush3.bf16.msra.mxu0 %v5827_v53 }
 0xa0b   : > { %5479 = vmatpush3.bf16.msra.mxu1 %v5828_v10  ;;  %5458 = vmatprep.subr.bf16.mxu0 %v5829_v54 }
 0xa0c   : > { %5480 = vmatprep.subr.bf16.mxu1 %v5830_v55 }
 0xa0e   : > { %5459 = vmatpush3.bf16.msra.mxu0 %v5831_v56 }
 0xa0f   : > { %5481 = vmatpush3.bf16.msra.mxu1 %v5832_v57  ;;  %5460 = vmatprep.subr.bf16.mxu0 %v5833_v58 }
 0xa10   : > { %5482 = vmatprep.subr.bf16.mxu1 %v5834_v59 }
 0xa12   : > { %5461 = vmatpush3.bf16.msra.mxu0 %v5835_v60 }
 0xa13   : > { %5483 = vmatpush3.bf16.msra.mxu1 %v5836_v61 }
 0xa15   : > { %4378 = vmatmul.mubr.bf16.vlgmr.msra.gmra.mrb[48].mxu0 %v6501_v48 }
 0xa16   : > { %4419 = vmatmul.mubr.bf16.vlgmr.msra.gmra.mrb[44].mxu1 %v6503_v49 }
 0xa88   : > { %v5330_v62 = vpop.f32.mrb[36].mxu0  ;;  %v5352_v63 = vpop.f32.mrb[32].mxu1 }
 0xa89   : > { %v5331_v25 = vpop.f32.mrb[37].mxu0  ;;  %v5353_v20 = vpop.f32.mrb[33].mxu1 }
 0xa8a   : > { %v5332_v21 = vadd.f32 %v5331_v25, %v5330_v62  ;;  %v5354_v0 = vadd.f32 %v5353_v20, %v5352_v63  ;;  %v5333_v11 = vpop.f32.mrb[38].mxu0  ;;  %v5355_v4 = vpop.f32.mrb[34].mxu1 }
 0xa8b   : > { %v5334_v14 = vpop.f32.mrb[39].mxu0  ;;  %v5356_v1 = vpop.f32.mrb[35].mxu1 }
 0xa8c   : > { %v4134_v5 = vadd.f32 %v5332_v21, %v5131_v19  ;;  %v5335_v17 = vadd.f32 %v5334_v14, %v5333_v11  ;;  %v5357_v48 = vadd.f32 %v5356_v1, %v5355_v4 }
 0xa8e   : > { %v4175_v2 = vadd.f32 %v5354_v0, %v4134_v5  ;;  %v4137_v49 = vadd.f32 %v5335_v17, %v5131_v19 }
 0xa90   : > { %v4178_v22 = vadd.f32 %v5357_v48, %v4137_v49 }
 0xaa8   : > { %v5374_v24 = vpop.f32.mrb[40].mxu0  ;;  %v5396_v26 = vpop.f32.mrb[36].mxu1 }
 0xaa9   : > { %v5375_v27 = vpop.f32.mrb[41].mxu0  ;;  %v5397_v3 = vpop.f32.mrb[37].mxu1 }
 0xaaa   : > { %v5376_v28 = vadd.f32 %v5375_v27, %v5374_v24  ;;  %v5398_v29 = vadd.f32 %v5397_v3, %v5396_v26  ;;  %v5377_v30 = vpop.f32.mrb[42].mxu0  ;;  %v5399_v33 = vpop.f32.mrb[38].mxu1 }
 0xaab   : > { %v5378_v34 = vpop.f32.mrb[43].mxu0  ;;  %v5400_v6 = vpop.f32.mrb[39].mxu1 }
 0xaac   : > { %v4216_v35 = vadd.f32 %v5376_v28, %v4175_v2  ;;  %v5379_v36 = vadd.f32 %v5378_v34, %v5377_v30  ;;  %v5401_v37 = vadd.f32 %v5400_v6, %v5399_v33  ;;  %v5260_v30 = vld [vmem:[%s815_s25] ss:$0 sm:$0xff] }
 0xaad   : > { %v5261_v6 = vld [vmem:[%s818_s21] ss:$0 sm:$0xff] }
 0xaae   : > { %v4257_v18 = vadd.f32 %v5398_v29, %v4216_v35  ;;  %v4219_v13 = vadd.f32 %v5379_v36, %v4178_v22 }
 0xab0   : > { %v4260_v23 = vadd.f32 %v5401_v37, %v4219_v13 }
 0xac8   : > { %v5418_v31 = vpop.f32.mrb[44].mxu0 }
 0xac9   : > { %v5440_v32 = vpop.f32.mrb[40].mxu1  ;;  %v5419_v38 = vpop.f32.mrb[45].mxu0 }
 0xaca   : > { %v5420_v39 = vadd.f32 %v5419_v38, %v5418_v31  ;;  %v5441_v40 = vpop.f32.mrb[41].mxu1  ;;  %v5421_v15 = vpop.f32.mrb[46].mxu0  ;;  %v5927_v38 = vmov (!%p5262_p9), 0.0  }
 0xacb   : > { %v5442_v16 = vadd.f32 %v5441_v40, %v5440_v32  ;;  %v5443_v41 = vpop.f32.mrb[42].mxu1  ;;  %v5422_v42 = vpop.f32.mrb[47].mxu0  ;;  %5598 = vmatprep.subr.mxu1 (!%p5262_p9), %v5927_v38  ;;  %5600 = vmatprep.mubr.msk.f32.mxu1 (!%p5262_p9), %vm5928_vm6, %v5927_v38 }
 0xacc   : > { %v4298_v43 = vadd.f32 %v5420_v39, %v4257_v18  ;;  %v5423_v12 = vadd.f32 %v5422_v42, %v5421_v15  ;;  %v5444_v44 = vpop.f32.mrb[43].mxu1  ;;  %5624 = vmatprep.mubr.msk.f32.mxu0 (!%p5262_p9), %vm5928_vm6, %v5927_v38 }
 0xacd   : > { %v5445_v45 = vadd.f32 %v5444_v44, %v5443_v41  ;;  %v4721_v44 = vld [vmem:[%s6741_s22] sm:$0xff] (!%p5262_p9) }
 0xace   : > { %v4339_v46 = vadd.f32 %v5442_v16, %v4298_v43  ;;  %v4301_v47 = vadd.f32 %v5423_v12, %v4260_v23  ;;  %v4524_v23 = vld [vmem:[%s6739_s0] sm:$0xff] (!%p5262_p9) }
 0xacf   : > { %5599 = vmatpush3.msra.mxu1 (!%p5262_p9), %v4524_v23  ;;  %v4727_v23 = vld [vmem:[%s6741_s22 + $0x30] sm:$0xff] (!%p5262_p9) }
 0xad0   : > { %v4342_v50 = vadd.f32 %v5445_v45, %v4301_v47  ;;  %5603 = vmatprep.subr.mxu1 (!%p5262_p9), %v5927_v38  ;;  %v4519_v45 = vld [vmem:[%s6740_s2] sm:$0x1] (!%p5262_p9) }
 0xae8   : > { %v5462_v51 = vpop.f32.mrb[48].mxu0 }
 0xae9   : > { %v5484_v52 = vpop.f32.mrb[44].mxu1  ;;  %v5463_v53 = vpop.f32.mrb[49].mxu0 }
 0xaea   : > { %v5464_v10 = vadd.f32 %v5463_v53, %v5462_v51  ;;  %v5485_v54 = vpop.f32.mrb[45].mxu1  ;;  %v5465_v55 = vpop.f32.mrb[50].mxu0  ;;  %v4521_v53 = vld [vmem:[%s6740_s2 + $0x2] sm:$0x1] (!%p5262_p9) }
 0xaeb   : > { %v5486_v56 = vadd.f32 %v5485_v54, %v5484_v52  ;;  %v5487_v57 = vpop.f32.mrb[46].mxu1  ;;  %v5466_v58 = vpop.f32.mrb[51].mxu0  ;;  %v4722_v54 = vld [vmem:[%s6741_s22 + $0x8] sm:$0xff] (!%p5262_p9) }
 0xaec   : > { %v4380_v59 = vadd.f32 %v5464_v10, %v4339_v46  ;;  %v5467_v60 = vadd.f32 %v5466_v58, %v5465_v55  ;;  %v5488_v61 = vpop.f32.mrb[47].mxu1  ;;  %v4520_v46 = vld [vmem:[%s6740_s2 + $0x1] sm:$0x1] (!%p5262_p9)  ;;  %v4522_v10 = vld [vmem:[%s6740_s2 + $0x3] sm:$0x1] (!%p5262_p9) }
 0xaed   : > { %v5489_v62 = vadd.f32 %v5488_v61, %v5487_v57  ;;  %v5929_v55 = vmov (!%p5262_p9), 1966171168   ;;  %v5628_v57 = vpack.c.bf16 (!%p5262_p9), %v4722_v54, %v4721_v44 }
 0xaee   : > { %v4421_v63 = vadd.f32 %v5486_v56, %v4380_v59  ;;  %v4383_v19 = vadd.f32 %v5467_v60, %v4342_v50  ;;  %v4614_v56 = vunpack.c.l.s4 (!%p5262_p9), %v5929_v55 }
 0xaf0   : > { %v4424_v25 = vadd.f32 %v5489_v62, %v4383_v19  ;;  %v4427_v20 = vadd.f32 %v4421_v63, %v6351_v7  ;;  %v5930_v62 = vmov (!%p5262_p9), 0.0|0.0   ;;  %v4611_v63 = vcombine.low (!%p5262_p9), %v4519_v45, %v4520_v46 }
 0xaf1   : > { %5627 = vmatprep.subr.bf16.mxu0 (!%p5262_p9), %v5930_v62  ;;  %v4612_v19 = vcombine.low (!%p5262_p9), %v4521_v53, %v4522_v10 }
 0xaf2   : > { %v4431_v21 = vsel %vm844_vm1, %v4427_v20, 0.0  ;;  %v4428_v0 = vadd.f32 %v4424_v25, %v6353_v9  ;;  %v4615_v25 = vunpack.c.0.s8 (!%p5262_p9), %v4614_v56  ;;  %5629 = vmatpush3.bf16.msra.mxu0 (!%p5262_p9), %v5628_v57 }
 0xaf3   : > { %4432 = vadd.xlane.f32.xlu1 %v4431_v21  ;;  %5630 = vmatprep.subr.bf16.mxu0 (!%p5262_p9), %v5930_v62 }
 0xaf4   : > { %v4434_v11 = vsel %vm844_vm1, %v4428_v0, 0.0 }
 0xaf5   : > { %4435 = vadd.xlane.f32.xlu0 %v4434_v11 }
 0xb80   : > { %v4433_v4 = vpop.xlane.xlu1 %4432 }
 0xb81   : > { %v4437_v14 = vmul.f32 0.125, %v4433_v4  ;;  %v4618_v4 = vsub.s32 (!%p5262_p9), %v4615_v25, %v6419_v8 }
 0xb82   : > { %v4436_v1 = vpop.xlane.xlu0 %4435 }
 0xb83   : > { %v4439_v5 = vsub.f32 %v4427_v20, %v4437_v14  ;;  %v4438_v17 = vmul.f32 0.125, %v4436_v1 }
 0xb85   : > { %v4440_v48 = vsub.f32 %v4428_v0, %v4438_v17  ;;  %v4441_v2 = vmul.f32 %v4439_v5, %v4439_v5 }
 0xb87   : > { %v4443_v49 = vsel %vm844_vm1, %v4441_v2, 0.0  ;;  %v4442_v22 = vmul.f32 %v4440_v48, %v4440_v48  ;;  %v4626_v2 = vrot.slane (!%p5262_p9), %v4612_v19, %v4618_v4 }
 0xb88   : > { %4444 = vadd.xlane.f32.xlu1 %v4443_v49 }
 0xb89   : > { %v4446_v7 = vsel %vm844_vm1, %v4442_v22, 0.0 }
 0xb8a   : > { %4447 = vadd.xlane.f32.xlu0 %v4446_v7 }
 0xc15   : > { %v4445_v9 = vpop.xlane.xlu1 %4444 }
 0xc16   : > { %v4449_v24 = vmul.f32 0.125, %v4445_v9 }
 0xc17   : > { %v4448_v26 = vpop.xlane.xlu0 %4447 }
 0xc18   : > { %v4451_v27 = vadd.f32 1e-05, %v4449_v24  ;;  %v4450_v3 = vmul.f32 0.125, %v4448_v26 }
 0xc1a   : > { %5873 = vrsqrt.f32 %v4451_v27  ;;  %v4452_v28 = vadd.f32 1e-05, %v4450_v3 }
 0xc1c   : > { %5875 = vrsqrt.f32 %v4452_v28 }
 0xc24   : > { %v5874_v29 = vpop.eup %5873 }
 0xc25   : > { %v4455_v33 = vmul.f32 %v5874_v29, %v4439_v5 }
 0xc26   : > { %v5876_v34 = vpop.eup %5875 }
 0xc27   : > { %v4463_v35 = vmul.f32 %v5260_v30, %v4455_v33  ;;  %v4456_v36 = vmul.f32 %v5876_v34, %v4440_v48  ;;  %4478 = sbr.rel (%p5262_p9) target bundleno = 3580 (0xdfc), region = 104  ;;  %v4619_v48 = vrot.slane (!%p5262_p9), %v4611_v63, %v4618_v4 }
 0xc29   : > { %v4471_v37 = vadd.f32 %v5261_v6, %v4463_v35  ;;  %v4464_v18 = vmul.f32 %v5260_v30, %v4456_v36  ;;  %v4627_v28 = vcombine.low (!%p5262_p9), %v4619_v48, %v4626_v2  ;;  %v4523_v30 = vld [vmem:[%s6742_s28] sm:$0x3f] (!%p5262_p9)  ;;  %v4724_v35 = vld [vmem:[%s6741_s22 + $0x18] sm:$0xff] (!%p5262_p9) }
 0xc2b   : > { %4473 = vst.msk [vmem:[#allocation2] sm:$0xff] %vm844_vm1, %v4471_v37  ;;  %v4472_v13 = vadd.f32 %v5261_v6, %v4464_v18  ;;  %v4481_v31 = vcombine.high (!%p5262_p9), %v4471_v37, %v4471_v37  ;;  %v4486_v39 = vsel (!%p5262_p9), %vm4485_vm7, %v4471_v37, 0.0  ;;  %v4634_v34 = vrot.slane (!%p5262_p9), %v4627_v28, %v4618_v4  ;;  %v4723_v6 = vld [vmem:[%s6741_s22 + $0x10] sm:$0xff] (!%p5262_p9)  ;;  %v4725_v37 = vld [vmem:[%s6741_s22 + $0x20] sm:$0xff] (!%p5262_p9)  ;;  %v4726_v18 = vld [vmem:[%s6741_s22 + $0x28] sm:$0xff] (!%p5262_p9) }
 0xc2c   : > { %v4487_v41 = vrot.slane (!%p5262_p9), %v4486_v39, 4  ;;  %v5631_v36 = vpack.c.bf16 (!%p5262_p9), %v4724_v35, %v4723_v6 }
 0xc2d   : > { %4474 = vst.msk [vmem:[#allocation2 + $0x8] sm:$0xff] %vm844_vm1, %v4472_v13  ;;  %v4482_v32 = vcombine.high (!%p5262_p9), %v4472_v13, %v4472_v13  ;;  %v4493_v40 = vsel (!%p5262_p9), %vm4485_vm7, %v4481_v31, 0.0  ;;  %v4500_v15 = vsel (!%p5262_p9), %vm4485_vm7, %v4472_v13, 0.0  ;;  %v5634_v13 = vpack.c.bf16 (!%p5262_p9), %v4726_v18, %v4725_v37  ;;  %v4728_v31 = vld [vmem:[%s6741_s22 + $0x38] sm:$0xff] (!%p5262_p9) }
 0xc2e   : > { %v4494_v42 = vrot.slane %v4493_v40, 4  ;;  %v4501_v43 = vrot.slane %v4500_v15, 4  ;;  %v4488_v47 = vadd.f32 %v4487_v41, %v4486_v39  ;;  %5632 = vmatpush3.bf16.msra.mxu0 %v5631_v36 }
 0xc2f   : > { %v4507_v16 = vsel %vm4485_vm7, %v4482_v32, 0.0  ;;  %5633 = vmatprep.subr.bf16.mxu0 %v5930_v62  ;;  %v5637_v32 = vpack.c.bf16 %v4728_v31, %v4727_v23 }
 0xc30   : > { %v4508_v12 = vrot.slane %v4507_v16, 4  ;;  %v4495_v50 = vadd.f32 %v4494_v42, %v4493_v40  ;;  %v4502_v51 = vadd.f32 %v4501_v43, %v4500_v15  ;;  %v4489_v58 = vrot.slane %v4488_v47, 2  ;;  %v5266_v15 = vld [vmem:[%s6743_s14] ss:$0 sm:$0xff] }
 0xc32   : > { %v4509_v52 = vadd.f32 %v4508_v12, %v4507_v16  ;;  %v4496_v59 = vrot.slane %v4495_v50, 2  ;;  %v4503_v60 = vrot.slane %v4502_v51, 2  ;;  %v4490_v20 = vadd.f32 %v4489_v58, %v4488_v47  ;;  %5635 = vmatpush3.bf16.msra.mxu0 %v5634_v13  ;;  %v5267_v12 = vld [vmem:[%s6745_s15] ss:$0 sm:$0xff] }
 0xc33   : > { %5636 = vmatprep.subr.bf16.mxu0 %v5930_v62 }
 0xc34   : > { %v4510_v61 = vrot.slane %v4509_v52, 2  ;;  %v4497_v21 = vadd.f32 %v4496_v59, %v4495_v50  ;;  %v4504_v0 = vadd.f32 %v4503_v60, %v4502_v51  ;;  %v4491_v14 = vrot.slane %v4490_v20, 1 }
 0xc36   : > { %v4511_v11 = vadd.f32 %v4510_v61, %v4509_v52  ;;  %v4498_v1 = vrot.slane %v4497_v21, 1  ;;  %v4505_v5 = vrot.slane %v4504_v0, 1  ;;  %v4492_v49 = vadd.f32 %v4491_v14, %v4490_v20  ;;  %5638 = vmatpush3.bf16.msra.mxu0 %v5637_v32 }
 0xc38   : > { %v4512_v17 = vrot.slane %v4511_v11, 1  ;;  %v4499_v22 = vadd.f32 %v4498_v1, %v4497_v21  ;;  %v4506_v7 = vadd.f32 %v4505_v5, %v4504_v0  ;;  %v4515_v24 = vmul.f32 0.25, %v4492_v49 }
 0xc3a   : > { %v4513_v9 = vadd.f32 %v4512_v17, %v4511_v11  ;;  %v4516_v26 = vmul.f32 0.25, %v4499_v22  ;;  %v4517_v27 = vmul.f32 0.25, %v4506_v7 }
 0xc3c   : > { %v4518_v3 = vmul.f32 0.25, %v4513_v9  ;;  %v4530_v29 = vsel %vm4529_vm8, %v4516_v26, %v4515_v24 }
 0xc3d   : > { %v4532_v8 = vsel %vm4531_vm9, %v4517_v27, %v4530_v29 }
 0xc3e   : > { %v4534_v33 = vsel %vm4533_vm10, %v4518_v3, %v4532_v8 }
 0xc3f   : > { %5601 = vmatmul.mubr.msk.f32.vlgmr.msra.gmra.mrb[0].mxu1 %vm844_vm1, %v4534_v33 }
 0xc40   : > { %5604 = vmatpush3.msk.msra.mxu1 %vm4638_vm11, %v4523_v30  ;;  %5605 = vmatprep.mubr.msk.f32.mxu1 %vm5928_vm6, %v5927_v38 }
 0xc43   : > { %5606 = vmatmul.mubr.msk.f32.vlgmr.msra.gmra.mrb[2].mxu1 %vm4635_vm12, %v4634_v34 }
 0xd12   : > { %v4603_v38 = vpop.f32.mrb[0].mxu1 }
 0xd13   : > { %v5602_v39 = vpop.f32.mrb[1].mxu1 }
 0xd16   : > { %v4708_v40 = vpop.f32.mrb[2].mxu1 }
 0xd17   : > { %v4709_v16 = vadd.f32 %v4708_v40, %v4603_v38  ;;  %v5607_v41 = vpop.f32.mrb[3].mxu1 }
 0xd19   : > { %v4719_v42 = vadd.f32 %v5266_v15, %v4709_v16 }
 0xd1b   : > { %v4720_v43 = vmax.f32 %v4719_v42, 0.0 }
 0xd1d   : > { %5625 = vmatmul.mubr.msk.f32.vlgmr.msra.gmra.mrb[0].mxu0 %vm4736_vm13, %v4720_v43 }
 0xdf0   : > { %v4806_v44 = vpop.f32.mrb[0].mxu0 }
 0xdf1   : > { %v4807_v45 = vadd.f32 %v5267_v12, %v4806_v44  ;;  %v5626_v46 = vpop.f32.mrb[1].mxu0 }
 0xdf3   : > { %v4817_v47 = vrot.slane %v4807_v45, %v4618_v4 }
 0xdf5   : > { %v4818_v50 = vcombine.high %v4817_v47, %v4817_v47  ;;  %v4825_v51 = vrot.slane %v4817_v47, %v4618_v4 }
 0xdf7   : > { %v4832_v52 = vrot.slane %v4818_v50, %v4618_v4  ;;  %v4833_v53 = vcombine.high %v4825_v51, %v4825_v51  ;;  %4840 = vst.msk [vmem:[%s6744_s26] sm:$0x1] %vm4839_vm14, %v4825_v51 }
 0xdf9   : > { %v4834_v10 = vcombine.high %v4832_v52, %v4832_v52  ;;  %4841 = vst.msk [vmem:[%s6744_s26 + $0x1] sm:$0x1] %vm4839_vm14, %v4832_v52  ;;  %4842 = vst.msk [vmem:[%s6744_s26 + $0x2] sm:$0x1] %vm4839_vm14, %v4833_v53 }
 0xdfb   : > { %4843 = vst.msk [vmem:[%s6744_s26 + $0x3] sm:$0x1] %vm4839_vm14, %v4834_v10 }
 0xdfc PF: > { %s6746_s28 = sld [smem:[#allocation6_spill]]  ;;  %s6747_s0 = sld [smem:[#allocation4_spill]] }
 0xdfd   : > { %s6748_s30 = sld [smem:[#allocation5_spill]]  ;;  %s6749_s20 = sld [smem:[#allocation7_spill]] }
 0xdfe   : > { %s6750_s21 = sld [smem:[#allocation8_spill]] }
 0xe02   : > { %s29_s1 = sadd.s32 1, %s6746_s28  }
 0xe03   : > { %p26_p10 = scmp.ge.s32.totalorder %s29_s1, 6  }
 0xe05   :  { %28 = sbr.rel (!%p26_p10) target bundleno = 11 (0xb), region = 173 }

</bundles_post_ra>
